<compile_context>
chip_gen: v5e
topology: v5e:2x2
jax: 0.10.0
libtpu: 0.0.40
codegen_flags: <defaults>
</compile_context>

<pallas_src>
import functools

import jax
import jax.numpy as jnp
from jax.experimental import pallas as pl
from jax.experimental.pallas import tpu as pltpu  # noqa: F401  (TPU backend import)


# ---------------------------------------------------------------------------
# Fused Pallas kernel: all LSTM layers + FC
# ---------------------------------------------------------------------------

def _textrnn_kernel(x_ref, *refs, num_layers, num_dirs, hidden_size, seq_len,
                    batch):
    """Whole TextRNN forward (post-embedding) in one kernel invocation.

    x_ref:  (T*B, E)  embedded tokens, time-major rows (row = t*B + b)
    refs:   per layer: [wih_cat (D_in, 4H*dirs), whh_fwd (H,4H),
                        (whh_rev (H,4H) if bidirectional), b_cat (1, 4H*dirs)],
            then fc_w (dirs*H, C), fc_b (1, C), and the output ref (B, C).
    """
    H, T, B = hidden_size, seq_len, batch

    # ---- unpack refs -------------------------------------------------------
    idx = 0
    layers = []
    for _ in range(num_layers):
        wih_ref = refs[idx]; idx += 1
        whh_refs = refs[idx:idx + num_dirs]; idx += num_dirs
        b_ref = refs[idx]; idx += 1
        layers.append((wih_ref, whh_refs, b_ref))
    fc_w_ref = refs[idx]
    fc_b_ref = refs[idx + 1]
    o_ref = refs[idx + 2]

    layer_in = x_ref[...]                                  # (T*B, D0)
    feats = None

    for l in range(num_layers):
        wih_ref, whh_refs, b_ref = layers[l]
        last_layer = (l == num_layers - 1)

        # Batched input projection for all timesteps and both directions,
        # with the bias added once (hoisted out of the recurrence).
        xw = (jnp.dot(layer_in, wih_ref[...],
                      preferred_element_type=jnp.float32)
              + b_ref[...])                                # (T*B, 4H*dirs)

        dir_seq = []
        dir_last = []
        for d in range(num_dirs):
            reverse = (d == 1)
            whh = whh_refs[d][...]                         # (H, 4H), loaded once
            base = d * 4 * H
            # Last layer: forward needs all T steps (but only final h);
            # reverse half of out[-1] is exactly one step on x[T-1].
            steps = 1 if (last_layer and reverse) else T

            h = jnp.zeros((B, H), jnp.float32)
            c = jnp.zeros((B, H), jnp.float32)
            hs = []
            for s in range(steps):                         # static, fully unrolled
                t = (T - 1 - s) if reverse else s
                g_in = xw[t * B:(t + 1) * B, base:base + 4 * H]     # (B, 4H)
                gates = g_in + jnp.dot(h, whh,
                                       preferred_element_type=jnp.float32)
                sg = jax.nn.sigmoid(gates)                 # whole-vreg EUP pass
                tg = jnp.tanh(gates)                       # whole-vreg EUP pass
                i_g = sg[:, 0 * H:1 * H]
                f_g = sg[:, 1 * H:2 * H]
                g_g = tg[:, 2 * H:3 * H]
                o_g = sg[:, 3 * H:4 * H]
                c = f_g * c + i_g * g_g
                h = o_g * jnp.tanh(c)
                hs.append(h)

            if last_layer:
                dir_last.append(h)                         # final h of this direction
            else:
                if reverse:
                    hs = hs[::-1]                          # back to time order
                dir_seq.append(jnp.concatenate(hs, axis=0))   # (T*B, H)

        if last_layer:
            feats = (dir_last[0] if num_dirs == 1
                     else jnp.concatenate(dir_last, axis=-1))   # (B, dirs*H)
        else:
            layer_in = (dir_seq[0] if num_dirs == 1
                        else jnp.concatenate(dir_seq, axis=-1))  # (T*B, dirs*H)

    # Fused final linear layer.
    o_ref[...] = (jnp.dot(feats, fc_w_ref[...],
                          preferred_element_type=jnp.float32)
                  + fc_b_ref[...])


# ---------------------------------------------------------------------------
# Wrapper
# ---------------------------------------------------------------------------

def text_rnn_forward(token_ids, params, *, num_layers, bidirectional):
    """token_ids: (batch, seq) int32. Returns (batch, num_classes)."""
    num_dirs = 2 if bidirectional else 1

    # x.permute(1, 0): (batch, seq) -> (seq, batch); embedding gather stays in XLA
    # (table lives in HBM; only the needed rows are gathered).
    ids = token_ids.T                                      # (T, B)
    T, B = ids.shape
    emb = jnp.take(params["embedding"], ids, axis=0)       # (T, B, E)
    # dropout: identity (eval mode)
    E = emb.shape[-1]
    x2d = emb.reshape(T * B, E)                            # time-major rows

    H = params["lstm"][(0, 0)]["whh_t"].shape[0]
    C = params["fc_w_t"].shape[1]

    args = [x2d]
    for l in range(num_layers):
        ps = [params["lstm"][(l, d)] for d in range(num_dirs)]
        wih_cat = (ps[0]["wih_t"] if num_dirs == 1
                   else jnp.concatenate([p["wih_t"] for p in ps], axis=1))
        b_cat = (ps[0]["b"] if num_dirs == 1
                 else jnp.concatenate([p["b"] for p in ps], axis=1))
        args.append(wih_cat)                               # (D_in, 4H*dirs)
        for p in ps:
            args.append(p["whh_t"])                        # (H, 4H) per direction
        args.append(b_cat)                                 # (1, 4H*dirs)
    args.append(params["fc_w_t"])                          # (dirs*H, C)
    args.append(params["fc_b"])                            # (1, C)

    kernel = functools.partial(
        _textrnn_kernel, num_layers=num_layers, num_dirs=num_dirs,
        hidden_size=H, seq_len=T, batch=B)

    return pl.pallas_call(
        kernel,
        out_shape=jax.ShapeDtypeStruct((B, C), jnp.float32),
    )(*args)


# ---------------------------------------------------------------------------
# Pure-JAX reference (for correctness check only)
# ---------------------------------------------------------------------------

def _lstm_layer_ref(x, wih_t, whh_t, b, *, reverse):
    T, B, _ = x.shape
    H = whh_t.shape[0]

    def step(carry, xt):
        h, c = carry
        gates = xt @ wih_t + h @ whh_t + b
        i = jax.nn.sigmoid(gates[:, :H])
        f = jax.nn.sigmoid(gates[:, H:2 * H])
        g = jnp.tanh(gates[:, 2 * H:3 * H])
        o = jax.nn.sigmoid(gates[:, 3 * H:])
        c = f * c + i * g
        h = o * jnp.tanh(c)
        return (h, c), h

    xs = x[::-1] if reverse else x
    init = (jnp.zeros((B, H), jnp.float32), jnp.zeros((B, H), jnp.float32))
    _, hs = jax.lax.scan(step, init, xs)
    return hs[::-1] if reverse else hs


def text_rnn_ref(token_ids, params, *, num_layers, bidirectional):
    ids = token_ids.T
    out = jnp.take(params["embedding"], ids, axis=0)
    num_dirs = 2 if bidirectional else 1
    for layer in range(num_layers):
        outs = []
        for d in range(num_dirs):
            p = params["lstm"][(layer, d)]
            outs.append(_lstm_layer_ref(out, p["wih_t"], p["whh_t"], p["b"],
                                        reverse=(d == 1)))
        out = jnp.concatenate(outs, axis=-1) if num_dirs == 2 else outs[0]
    return out[-1] @ params["fc_w_t"] + params["fc_b"]


# ---------------------------------------------------------------------------
# Parameter init (deterministic, synthetic)
# ---------------------------------------------------------------------------

def init_params(key, *, vocab_size, emb_dim, hidden_size, num_classes,
                num_layers, bidirectional):
    num_dirs = 2 if bidirectional else 1
    keys = jax.random.split(key, 3 + 4 * num_layers * num_dirs)
    kidx = 0

    def nxt():
        nonlocal kidx
        k = keys[kidx]
        kidx += 1
        return k

    scale = 1.0 / jnp.sqrt(hidden_size)
    params = {
        "embedding": jax.random.normal(nxt(), (vocab_size, emb_dim),
                                       jnp.float32) * 0.1,
        "lstm": {},
    }
    for layer in range(num_layers):
        d_in = emb_dim if layer == 0 else hidden_size * num_dirs
        for d in range(num_dirs):
            wih = jax.random.uniform(nxt(), (4 * hidden_size, d_in),
                                     jnp.float32, -scale, scale)
            whh = jax.random.uniform(nxt(), (4 * hidden_size, hidden_size),
                                     jnp.float32, -scale, scale)
            b_ih = jax.random.uniform(nxt(), (4 * hidden_size,),
                                      jnp.float32, -scale, scale)
            b_hh = jax.random.uniform(nxt(), (4 * hidden_size,),
                                      jnp.float32, -scale, scale)
            params["lstm"][(layer, d)] = {
                "wih_t": wih.T,                         # (D_in, 4H)
                "whh_t": whh.T,                         # (H, 4H)
                "b": (b_ih + b_hh).reshape(1, -1),      # (1, 4H)
            }
    fc_in = hidden_size * num_dirs
    fc_w = jax.random.uniform(nxt(), (num_classes, fc_in), jnp.float32,
                              -1.0 / jnp.sqrt(fc_in), 1.0 / jnp.sqrt(fc_in))
    fc_b = jax.random.uniform(nxt(), (num_classes,), jnp.float32,
                              -1.0 / jnp.sqrt(fc_in), 1.0 / jnp.sqrt(fc_in))
    params["fc_w_t"] = fc_w.T                           # (F, C)
    params["fc_b"] = fc_b.reshape(1, -1)                # (1, C)
    return params


# ---------------------------------------------------------------------------
# Main
# ---------------------------------------------------------------------------

if __name__ == "__main__":
    vocab_size = 50
    emb_dim = 16
    hidden_size = 32
    num_classes = 4
    num_layers = 2
    bidirectional = True
    batch = 4
    seq_len = 8

    key = jax.random.PRNGKey(0)
    k_param, k_data = jax.random.split(key)
    params = init_params(
        k_param, vocab_size=vocab_size, emb_dim=emb_dim,
        hidden_size=hidden_size, num_classes=num_classes,
        num_layers=num_layers, bidirectional=bidirectional)

    token_ids = jax.random.randint(k_data, (batch, seq_len), 0, vocab_size,
                                   dtype=jnp.int32)

    fwd = jax.jit(functools.partial(text_rnn_forward, num_layers=num_layers,
                                    bidirectional=bidirectional))
    out = fwd(token_ids, params)
    out = jax.block_until_ready(out)

    ref = text_rnn_ref(token_ids, params, num_layers=num_layers,
                       bidirectional=bidirectional)
    ref = jax.block_until_ready(ref)

    assert out.shape == (batch, num_classes), out.shape
    assert jnp.allclose(out, ref, atol=1e-4, rtol=1e-4), (
        f"max abs err {jnp.max(jnp.abs(out - ref))}")

    print("KERNEL_OK")
</pallas_src>

<mosaic_0001>
module attributes {stable_mosaic.version = 11 : i64} {
  func.func @_textrnn_kernel(%arg0: memref<32x16xf32, #tpu.memory_space<vmem>>, %arg1: memref<16x256xf32, #tpu.memory_space<vmem>>, %arg2: memref<32x128xf32, #tpu.memory_space<vmem>>, %arg3: memref<32x128xf32, #tpu.memory_space<vmem>>, %arg4: memref<1x256xf32, #tpu.memory_space<vmem>>, %arg5: memref<64x256xf32, #tpu.memory_space<vmem>>, %arg6: memref<32x128xf32, #tpu.memory_space<vmem>>, %arg7: memref<32x128xf32, #tpu.memory_space<vmem>>, %arg8: memref<1x256xf32, #tpu.memory_space<vmem>>, %arg9: memref<64x4xf32, #tpu.memory_space<vmem>>, %arg10: memref<1x4xf32, #tpu.memory_space<vmem>>, %arg11: memref<4x4xf32, #tpu.memory_space<vmem>>) attributes {dimension_semantics = [], scalar_prefetch = 0 : i64, scratch_operands = 0 : i64, tpu.core_type = #tpu.core_type<tc>} {
    %c0 = arith.constant 0 : index
    %c0_0 = arith.constant 0 : index
    %0 = vector.load %arg0[%c0, %c0_0] : memref<32x16xf32, #tpu.memory_space<vmem>>, vector<32x16xf32>
    %c0_1 = arith.constant 0 : index
    %c0_2 = arith.constant 0 : index
    %1 = vector.load %arg1[%c0_1, %c0_2] : memref<16x256xf32, #tpu.memory_space<vmem>>, vector<16x256xf32>
    %cst = arith.constant dense<0.000000e+00> : vector<32x256xf32>
    %2 = tpu.matmul %0, %1, %cst {dimension_numbers = #tpu.dot_dimension_numbers<[1], [0], [0], [1], [0, 0, 1, 1], [], []>} : vector<32x16xf32>, vector<16x256xf32>, vector<32x256xf32> -> vector<32x256xf32>
    %c0_3 = arith.constant 0 : index
    %c0_4 = arith.constant 0 : index
    %3 = vector.load %arg4[%c0_3, %c0_4] : memref<1x256xf32, #tpu.memory_space<vmem>>, vector<1x256xf32>
    %4 = vector.broadcast %3 : vector<1x256xf32> to vector<32x256xf32>
    %5 = arith.addf %2, %4 : vector<32x256xf32>
    %c0_5 = arith.constant 0 : index
    %c0_6 = arith.constant 0 : index
    %6 = vector.load %arg2[%c0_5, %c0_6] : memref<32x128xf32, #tpu.memory_space<vmem>>, vector<32x128xf32>
    %cst_7 = arith.constant 0.000000e+00 : f32
    %7 = vector.broadcast %cst_7 : f32 to vector<4x32xf32>
    %cst_8 = arith.constant 0.000000e+00 : f32
    %8 = vector.broadcast %cst_8 : f32 to vector<4x32xf32>
    %9 = vector.extract_strided_slice %5 {offsets = [0, 0], sizes = [4, 128], strides = [1, 1]} : vector<32x256xf32> to vector<4x128xf32>
    %cst_9 = arith.constant dense<0.000000e+00> : vector<4x128xf32>
    %10 = tpu.matmul %7, %6, %cst_9 {dimension_numbers = #tpu.dot_dimension_numbers<[1], [0], [0], [1], [0, 0, 1, 1], [], []>} : vector<4x32xf32>, vector<32x128xf32>, vector<4x128xf32> -> vector<4x128xf32>
    %11 = arith.addf %9, %10 : vector<4x128xf32>
    %12 = arith.negf %11 : vector<4x128xf32>
    %13 = math.exp %12 : vector<4x128xf32>
    %cst_10 = arith.constant 1.000000e+00 : f32
    %14 = vector.broadcast %cst_10 : f32 to vector<4x128xf32>
    %15 = arith.addf %14, %13 : vector<4x128xf32>
    %16 = arith.divf %14, %15 : vector<4x128xf32>
    %17 = math.tanh %11 : vector<4x128xf32>
    %18 = vector.extract_strided_slice %16 {offsets = [0, 0], sizes = [4, 32], strides = [1, 1]} : vector<4x128xf32> to vector<4x32xf32>
    %19 = vector.extract_strided_slice %16 {offsets = [0, 32], sizes = [4, 32], strides = [1, 1]} : vector<4x128xf32> to vector<4x32xf32>
    %20 = vector.extract_strided_slice %17 {offsets = [0, 64], sizes = [4, 32], strides = [1, 1]} : vector<4x128xf32> to vector<4x32xf32>
    %21 = vector.extract_strided_slice %16 {offsets = [0, 96], sizes = [4, 32], strides = [1, 1]} : vector<4x128xf32> to vector<4x32xf32>
    %22 = arith.mulf %19, %8 : vector<4x32xf32>
    %23 = arith.mulf %18, %20 : vector<4x32xf32>
    %24 = arith.addf %22, %23 : vector<4x32xf32>
    %25 = math.tanh %24 : vector<4x32xf32>
    %26 = arith.mulf %21, %25 : vector<4x32xf32>
    %27 = vector.extract_strided_slice %5 {offsets = [4, 0], sizes = [4, 128], strides = [1, 1]} : vector<32x256xf32> to vector<4x128xf32>
    %cst_11 = arith.constant dense<0.000000e+00> : vector<4x128xf32>
    %28 = tpu.matmul %26, %6, %cst_11 {dimension_numbers = #tpu.dot_dimension_numbers<[1], [0], [0], [1], [0, 0, 1, 1], [], []>} : vector<4x32xf32>, vector<32x128xf32>, vector<4x128xf32> -> vector<4x128xf32>
    %29 = arith.addf %27, %28 : vector<4x128xf32>
    %30 = arith.negf %29 : vector<4x128xf32>
    %31 = math.exp %30 : vector<4x128xf32>
    %cst_12 = arith.constant 1.000000e+00 : f32
    %32 = vector.broadcast %cst_12 : f32 to vector<4x128xf32>
    %33 = arith.addf %32, %31 : vector<4x128xf32>
    %34 = arith.divf %32, %33 : vector<4x128xf32>
    %35 = math.tanh %29 : vector<4x128xf32>
    %36 = vector.extract_strided_slice %34 {offsets = [0, 0], sizes = [4, 32], strides = [1, 1]} : vector<4x128xf32> to vector<4x32xf32>
    %37 = vector.extract_strided_slice %34 {offsets = [0, 32], sizes = [4, 32], strides = [1, 1]} : vector<4x128xf32> to vector<4x32xf32>
    %38 = vector.extract_strided_slice %35 {offsets = [0, 64], sizes = [4, 32], strides = [1, 1]} : vector<4x128xf32> to vector<4x32xf32>
    %39 = vector.extract_strided_slice %34 {offsets = [0, 96], sizes = [4, 32], strides = [1, 1]} : vector<4x128xf32> to vector<4x32xf32>
    %40 = arith.mulf %37, %24 : vector<4x32xf32>
    %41 = arith.mulf %36, %38 : vector<4x32xf32>
    %42 = arith.addf %40, %41 : vector<4x32xf32>
    %43 = math.tanh %42 : vector<4x32xf32>
    %44 = arith.mulf %39, %43 : vector<4x32xf32>
    %45 = vector.extract_strided_slice %5 {offsets = [8, 0], sizes = [4, 128], strides = [1, 1]} : vector<32x256xf32> to vector<4x128xf32>
    %cst_13 = arith.constant dense<0.000000e+00> : vector<4x128xf32>
    %46 = tpu.matmul %44, %6, %cst_13 {dimension_numbers = #tpu.dot_dimension_numbers<[1], [0], [0], [1], [0, 0, 1, 1], [], []>} : vector<4x32xf32>, vector<32x128xf32>, vector<4x128xf32> -> vector<4x128xf32>
    %47 = arith.addf %45, %46 : vector<4x128xf32>
    %48 = arith.negf %47 : vector<4x128xf32>
    %49 = math.exp %48 : vector<4x128xf32>
    %cst_14 = arith.constant 1.000000e+00 : f32
    %50 = vector.broadcast %cst_14 : f32 to vector<4x128xf32>
    %51 = arith.addf %50, %49 : vector<4x128xf32>
    %52 = arith.divf %50, %51 : vector<4x128xf32>
    %53 = math.tanh %47 : vector<4x128xf32>
    %54 = vector.extract_strided_slice %52 {offsets = [0, 0], sizes = [4, 32], strides = [1, 1]} : vector<4x128xf32> to vector<4x32xf32>
    %55 = vector.extract_strided_slice %52 {offsets = [0, 32], sizes = [4, 32], strides = [1, 1]} : vector<4x128xf32> to vector<4x32xf32>
    %56 = vector.extract_strided_slice %53 {offsets = [0, 64], sizes = [4, 32], strides = [1, 1]} : vector<4x128xf32> to vector<4x32xf32>
    %57 = vector.extract_strided_slice %52 {offsets = [0, 96], sizes = [4, 32], strides = [1, 1]} : vector<4x128xf32> to vector<4x32xf32>
    %58 = arith.mulf %55, %42 : vector<4x32xf32>
    %59 = arith.mulf %54, %56 : vector<4x32xf32>
    %60 = arith.addf %58, %59 : vector<4x32xf32>
    %61 = math.tanh %60 : vector<4x32xf32>
    %62 = arith.mulf %57, %61 : vector<4x32xf32>
    %63 = vector.extract_strided_slice %5 {offsets = [12, 0], sizes = [4, 128], strides = [1, 1]} : vector<32x256xf32> to vector<4x128xf32>
    %cst_15 = arith.constant dense<0.000000e+00> : vector<4x128xf32>
    %64 = tpu.matmul %62, %6, %cst_15 {dimension_numbers = #tpu.dot_dimension_numbers<[1], [0], [0], [1], [0, 0, 1, 1], [], []>} : vector<4x32xf32>, vector<32x128xf32>, vector<4x128xf32> -> vector<4x128xf32>
    %65 = arith.addf %63, %64 : vector<4x128xf32>
    %66 = arith.negf %65 : vector<4x128xf32>
    %67 = math.exp %66 : vector<4x128xf32>
    %cst_16 = arith.constant 1.000000e+00 : f32
    %68 = vector.broadcast %cst_16 : f32 to vector<4x128xf32>
    %69 = arith.addf %68, %67 : vector<4x128xf32>
    %70 = arith.divf %68, %69 : vector<4x128xf32>
    %71 = math.tanh %65 : vector<4x128xf32>
    %72 = vector.extract_strided_slice %70 {offsets = [0, 0], sizes = [4, 32], strides = [1, 1]} : vector<4x128xf32> to vector<4x32xf32>
    %73 = vector.extract_strided_slice %70 {offsets = [0, 32], sizes = [4, 32], strides = [1, 1]} : vector<4x128xf32> to vector<4x32xf32>
    %74 = vector.extract_strided_slice %71 {offsets = [0, 64], sizes = [4, 32], strides = [1, 1]} : vector<4x128xf32> to vector<4x32xf32>
    %75 = vector.extract_strided_slice %70 {offsets = [0, 96], sizes = [4, 32], strides = [1, 1]} : vector<4x128xf32> to vector<4x32xf32>
    %76 = arith.mulf %73, %60 : vector<4x32xf32>
    %77 = arith.mulf %72, %74 : vector<4x32xf32>
    %78 = arith.addf %76, %77 : vector<4x32xf32>
    %79 = math.tanh %78 : vector<4x32xf32>
    %80 = arith.mulf %75, %79 : vector<4x32xf32>
    %81 = vector.extract_strided_slice %5 {offsets = [16, 0], sizes = [4, 128], strides = [1, 1]} : vector<32x256xf32> to vector<4x128xf32>
    %cst_17 = arith.constant dense<0.000000e+00> : vector<4x128xf32>
    %82 = tpu.matmul %80, %6, %cst_17 {dimension_numbers = #tpu.dot_dimension_numbers<[1], [0], [0], [1], [0, 0, 1, 1], [], []>} : vector<4x32xf32>, vector<32x128xf32>, vector<4x128xf32> -> vector<4x128xf32>
    %83 = arith.addf %81, %82 : vector<4x128xf32>
    %84 = arith.negf %83 : vector<4x128xf32>
    %85 = math.exp %84 : vector<4x128xf32>
    %cst_18 = arith.constant 1.000000e+00 : f32
    %86 = vector.broadcast %cst_18 : f32 to vector<4x128xf32>
    %87 = arith.addf %86, %85 : vector<4x128xf32>
    %88 = arith.divf %86, %87 : vector<4x128xf32>
    %89 = math.tanh %83 : vector<4x128xf32>
    %90 = vector.extract_strided_slice %88 {offsets = [0, 0], sizes = [4, 32], strides = [1, 1]} : vector<4x128xf32> to vector<4x32xf32>
    %91 = vector.extract_strided_slice %88 {offsets = [0, 32], sizes = [4, 32], strides = [1, 1]} : vector<4x128xf32> to vector<4x32xf32>
    %92 = vector.extract_strided_slice %89 {offsets = [0, 64], sizes = [4, 32], strides = [1, 1]} : vector<4x128xf32> to vector<4x32xf32>
    %93 = vector.extract_strided_slice %88 {offsets = [0, 96], sizes = [4, 32], strides = [1, 1]} : vector<4x128xf32> to vector<4x32xf32>
    %94 = arith.mulf %91, %78 : vector<4x32xf32>
    %95 = arith.mulf %90, %92 : vector<4x32xf32>
    %96 = arith.addf %94, %95 : vector<4x32xf32>
    %97 = math.tanh %96 : vector<4x32xf32>
    %98 = arith.mulf %93, %97 : vector<4x32xf32>
    %99 = vector.extract_strided_slice %5 {offsets = [20, 0], sizes = [4, 128], strides = [1, 1]} : vector<32x256xf32> to vector<4x128xf32>
    %cst_19 = arith.constant dense<0.000000e+00> : vector<4x128xf32>
    %100 = tpu.matmul %98, %6, %cst_19 {dimension_numbers = #tpu.dot_dimension_numbers<[1], [0], [0], [1], [0, 0, 1, 1], [], []>} : vector<4x32xf32>, vector<32x128xf32>, vector<4x128xf32> -> vector<4x128xf32>
    %101 = arith.addf %99, %100 : vector<4x128xf32>
    %102 = arith.negf %101 : vector<4x128xf32>
    %103 = math.exp %102 : vector<4x128xf32>
    %cst_20 = arith.constant 1.000000e+00 : f32
    %104 = vector.broadcast %cst_20 : f32 to vector<4x128xf32>
    %105 = arith.addf %104, %103 : vector<4x128xf32>
    %106 = arith.divf %104, %105 : vector<4x128xf32>
    %107 = math.tanh %101 : vector<4x128xf32>
    %108 = vector.extract_strided_slice %106 {offsets = [0, 0], sizes = [4, 32], strides = [1, 1]} : vector<4x128xf32> to vector<4x32xf32>
    %109 = vector.extract_strided_slice %106 {offsets = [0, 32], sizes = [4, 32], strides = [1, 1]} : vector<4x128xf32> to vector<4x32xf32>
    %110 = vector.extract_strided_slice %107 {offsets = [0, 64], sizes = [4, 32], strides = [1, 1]} : vector<4x128xf32> to vector<4x32xf32>
    %111 = vector.extract_strided_slice %106 {offsets = [0, 96], sizes = [4, 32], strides = [1, 1]} : vector<4x128xf32> to vector<4x32xf32>
    %112 = arith.mulf %109, %96 : vector<4x32xf32>
    %113 = arith.mulf %108, %110 : vector<4x32xf32>
    %114 = arith.addf %112, %113 : vector<4x32xf32>
    %115 = math.tanh %114 : vector<4x32xf32>
    %116 = arith.mulf %111, %115 : vector<4x32xf32>
    %117 = vector.extract_strided_slice %5 {offsets = [24, 0], sizes = [4, 128], strides = [1, 1]} : vector<32x256xf32> to vector<4x128xf32>
    %cst_21 = arith.constant dense<0.000000e+00> : vector<4x128xf32>
    %118 = tpu.matmul %116, %6, %cst_21 {dimension_numbers = #tpu.dot_dimension_numbers<[1], [0], [0], [1], [0, 0, 1, 1], [], []>} : vector<4x32xf32>, vector<32x128xf32>, vector<4x128xf32> -> vector<4x128xf32>
    %119 = arith.addf %117, %118 : vector<4x128xf32>
    %120 = arith.negf %119 : vector<4x128xf32>
    %121 = math.exp %120 : vector<4x128xf32>
    %cst_22 = arith.constant 1.000000e+00 : f32
    %122 = vector.broadcast %cst_22 : f32 to vector<4x128xf32>
    %123 = arith.addf %122, %121 : vector<4x128xf32>
    %124 = arith.divf %122, %123 : vector<4x128xf32>
    %125 = math.tanh %119 : vector<4x128xf32>
    %126 = vector.extract_strided_slice %124 {offsets = [0, 0], sizes = [4, 32], strides = [1, 1]} : vector<4x128xf32> to vector<4x32xf32>
    %127 = vector.extract_strided_slice %124 {offsets = [0, 32], sizes = [4, 32], strides = [1, 1]} : vector<4x128xf32> to vector<4x32xf32>
    %128 = vector.extract_strided_slice %125 {offsets = [0, 64], sizes = [4, 32], strides = [1, 1]} : vector<4x128xf32> to vector<4x32xf32>
    %129 = vector.extract_strided_slice %124 {offsets = [0, 96], sizes = [4, 32], strides = [1, 1]} : vector<4x128xf32> to vector<4x32xf32>
    %130 = arith.mulf %127, %114 : vector<4x32xf32>
    %131 = arith.mulf %126, %128 : vector<4x32xf32>
    %132 = arith.addf %130, %131 : vector<4x32xf32>
    %133 = math.tanh %132 : vector<4x32xf32>
    %134 = arith.mulf %129, %133 : vector<4x32xf32>
    %135 = vector.extract_strided_slice %5 {offsets = [28, 0], sizes = [4, 128], strides = [1, 1]} : vector<32x256xf32> to vector<4x128xf32>
    %cst_23 = arith.constant dense<0.000000e+00> : vector<4x128xf32>
    %136 = tpu.matmul %134, %6, %cst_23 {dimension_numbers = #tpu.dot_dimension_numbers<[1], [0], [0], [1], [0, 0, 1, 1], [], []>} : vector<4x32xf32>, vector<32x128xf32>, vector<4x128xf32> -> vector<4x128xf32>
    %137 = arith.addf %135, %136 : vector<4x128xf32>
    %138 = arith.negf %137 : vector<4x128xf32>
    %139 = math.exp %138 : vector<4x128xf32>
    %cst_24 = arith.constant 1.000000e+00 : f32
    %140 = vector.broadcast %cst_24 : f32 to vector<4x128xf32>
    %141 = arith.addf %140, %139 : vector<4x128xf32>
    %142 = arith.divf %140, %141 : vector<4x128xf32>
    %143 = math.tanh %137 : vector<4x128xf32>
    %144 = vector.extract_strided_slice %142 {offsets = [0, 0], sizes = [4, 32], strides = [1, 1]} : vector<4x128xf32> to vector<4x32xf32>
    %145 = vector.extract_strided_slice %142 {offsets = [0, 32], sizes = [4, 32], strides = [1, 1]} : vector<4x128xf32> to vector<4x32xf32>
    %146 = vector.extract_strided_slice %143 {offsets = [0, 64], sizes = [4, 32], strides = [1, 1]} : vector<4x128xf32> to vector<4x32xf32>
    %147 = vector.extract_strided_slice %142 {offsets = [0, 96], sizes = [4, 32], strides = [1, 1]} : vector<4x128xf32> to vector<4x32xf32>
    %148 = arith.mulf %145, %132 : vector<4x32xf32>
    %149 = arith.mulf %144, %146 : vector<4x32xf32>
    %150 = arith.addf %148, %149 : vector<4x32xf32>
    %151 = math.tanh %150 : vector<4x32xf32>
    %152 = arith.mulf %147, %151 : vector<4x32xf32>
    %153 = tpu.concatenate %26, %44, %62, %80, %98, %116, %134, %152 in 0 : vector<4x32xf32>, vector<4x32xf32>, vector<4x32xf32>, vector<4x32xf32>, vector<4x32xf32>, vector<4x32xf32>, vector<4x32xf32>, vector<4x32xf32> -> vector<32x32xf32>
    %c0_25 = arith.constant 0 : index
    %c0_26 = arith.constant 0 : index
    %154 = vector.load %arg3[%c0_25, %c0_26] : memref<32x128xf32, #tpu.memory_space<vmem>>, vector<32x128xf32>
    %cst_27 = arith.constant 0.000000e+00 : f32
    %155 = vector.broadcast %cst_27 : f32 to vector<4x32xf32>
    %cst_28 = arith.constant 0.000000e+00 : f32
    %156 = vector.broadcast %cst_28 : f32 to vector<4x32xf32>
    %157 = vector.extract_strided_slice %5 {offsets = [28, 128], sizes = [4, 128], strides = [1, 1]} : vector<32x256xf32> to vector<4x128xf32>
    %cst_29 = arith.constant dense<0.000000e+00> : vector<4x128xf32>
    %158 = tpu.matmul %155, %154, %cst_29 {dimension_numbers = #tpu.dot_dimension_numbers<[1], [0], [0], [1], [0, 0, 1, 1], [], []>} : vector<4x32xf32>, vector<32x128xf32>, vector<4x128xf32> -> vector<4x128xf32>
    %159 = arith.addf %157, %158 : vector<4x128xf32>
    %160 = arith.negf %159 : vector<4x128xf32>
    %161 = math.exp %160 : vector<4x128xf32>
    %cst_30 = arith.constant 1.000000e+00 : f32
    %162 = vector.broadcast %cst_30 : f32 to vector<4x128xf32>
    %163 = arith.addf %162, %161 : vector<4x128xf32>
    %164 = arith.divf %162, %163 : vector<4x128xf32>
    %165 = math.tanh %159 : vector<4x128xf32>
    %166 = vector.extract_strided_slice %164 {offsets = [0, 0], sizes = [4, 32], strides = [1, 1]} : vector<4x128xf32> to vector<4x32xf32>
    %167 = vector.extract_strided_slice %164 {offsets = [0, 32], sizes = [4, 32], strides = [1, 1]} : vector<4x128xf32> to vector<4x32xf32>
    %168 = vector.extract_strided_slice %165 {offsets = [0, 64], sizes = [4, 32], strides = [1, 1]} : vector<4x128xf32> to vector<4x32xf32>
    %169 = vector.extract_strided_slice %164 {offsets = [0, 96], sizes = [4, 32], strides = [1, 1]} : vector<4x128xf32> to vector<4x32xf32>
    %170 = arith.mulf %167, %156 : vector<4x32xf32>
    %171 = arith.mulf %166, %168 : vector<4x32xf32>
    %172 = arith.addf %170, %171 : vector<4x32xf32>
    %173 = math.tanh %172 : vector<4x32xf32>
    %174 = arith.mulf %169, %173 : vector<4x32xf32>
    %175 = vector.extract_strided_slice %5 {offsets = [24, 128], sizes = [4, 128], strides = [1, 1]} : vector<32x256xf32> to vector<4x128xf32>
    %cst_31 = arith.constant dense<0.000000e+00> : vector<4x128xf32>
    %176 = tpu.matmul %174, %154, %cst_31 {dimension_numbers = #tpu.dot_dimension_numbers<[1], [0], [0], [1], [0, 0, 1, 1], [], []>} : vector<4x32xf32>, vector<32x128xf32>, vector<4x128xf32> -> vector<4x128xf32>
    %177 = arith.addf %175, %176 : vector<4x128xf32>
    %178 = arith.negf %177 : vector<4x128xf32>
    %179 = math.exp %178 : vector<4x128xf32>
    %cst_32 = arith.constant 1.000000e+00 : f32
    %180 = vector.broadcast %cst_32 : f32 to vector<4x128xf32>
    %181 = arith.addf %180, %179 : vector<4x128xf32>
    %182 = arith.divf %180, %181 : vector<4x128xf32>
    %183 = math.tanh %177 : vector<4x128xf32>
    %184 = vector.extract_strided_slice %182 {offsets = [0, 0], sizes = [4, 32], strides = [1, 1]} : vector<4x128xf32> to vector<4x32xf32>
    %185 = vector.extract_strided_slice %182 {offsets = [0, 32], sizes = [4, 32], strides = [1, 1]} : vector<4x128xf32> to vector<4x32xf32>
    %186 = vector.extract_strided_slice %183 {offsets = [0, 64], sizes = [4, 32], strides = [1, 1]} : vector<4x128xf32> to vector<4x32xf32>
    %187 = vector.extract_strided_slice %182 {offsets = [0, 96], sizes = [4, 32], strides = [1, 1]} : vector<4x128xf32> to vector<4x32xf32>
    %188 = arith.mulf %185, %172 : vector<4x32xf32>
    %189 = arith.mulf %184, %186 : vector<4x32xf32>
    %190 = arith.addf %188, %189 : vector<4x32xf32>
    %191 = math.tanh %190 : vector<4x32xf32>
    %192 = arith.mulf %187, %191 : vector<4x32xf32>
    %193 = vector.extract_strided_slice %5 {offsets = [20, 128], sizes = [4, 128], strides = [1, 1]} : vector<32x256xf32> to vector<4x128xf32>
    %cst_33 = arith.constant dense<0.000000e+00> : vector<4x128xf32>
    %194 = tpu.matmul %192, %154, %cst_33 {dimension_numbers = #tpu.dot_dimension_numbers<[1], [0], [0], [1], [0, 0, 1, 1], [], []>} : vector<4x32xf32>, vector<32x128xf32>, vector<4x128xf32> -> vector<4x128xf32>
    %195 = arith.addf %193, %194 : vector<4x128xf32>
    %196 = arith.negf %195 : vector<4x128xf32>
    %197 = math.exp %196 : vector<4x128xf32>
    %cst_34 = arith.constant 1.000000e+00 : f32
    %198 = vector.broadcast %cst_34 : f32 to vector<4x128xf32>
    %199 = arith.addf %198, %197 : vector<4x128xf32>
    %200 = arith.divf %198, %199 : vector<4x128xf32>
    %201 = math.tanh %195 : vector<4x128xf32>
    %202 = vector.extract_strided_slice %200 {offsets = [0, 0], sizes = [4, 32], strides = [1, 1]} : vector<4x128xf32> to vector<4x32xf32>
    %203 = vector.extract_strided_slice %200 {offsets = [0, 32], sizes = [4, 32], strides = [1, 1]} : vector<4x128xf32> to vector<4x32xf32>
    %204 = vector.extract_strided_slice %201 {offsets = [0, 64], sizes = [4, 32], strides = [1, 1]} : vector<4x128xf32> to vector<4x32xf32>
    %205 = vector.extract_strided_slice %200 {offsets = [0, 96], sizes = [4, 32], strides = [1, 1]} : vector<4x128xf32> to vector<4x32xf32>
    %206 = arith.mulf %203, %190 : vector<4x32xf32>
    %207 = arith.mulf %202, %204 : vector<4x32xf32>
    %208 = arith.addf %206, %207 : vector<4x32xf32>
    %209 = math.tanh %208 : vector<4x32xf32>
    %210 = arith.mulf %205, %209 : vector<4x32xf32>
    %211 = vector.extract_strided_slice %5 {offsets = [16, 128], sizes = [4, 128], strides = [1, 1]} : vector<32x256xf32> to vector<4x128xf32>
    %cst_35 = arith.constant dense<0.000000e+00> : vector<4x128xf32>
    %212 = tpu.matmul %210, %154, %cst_35 {dimension_numbers = #tpu.dot_dimension_numbers<[1], [0], [0], [1], [0, 0, 1, 1], [], []>} : vector<4x32xf32>, vector<32x128xf32>, vector<4x128xf32> -> vector<4x128xf32>
    %213 = arith.addf %211, %212 : vector<4x128xf32>
    %214 = arith.negf %213 : vector<4x128xf32>
    %215 = math.exp %214 : vector<4x128xf32>
    %cst_36 = arith.constant 1.000000e+00 : f32
    %216 = vector.broadcast %cst_36 : f32 to vector<4x128xf32>
    %217 = arith.addf %216, %215 : vector<4x128xf32>
    %218 = arith.divf %216, %217 : vector<4x128xf32>
    %219 = math.tanh %213 : vector<4x128xf32>
    %220 = vector.extract_strided_slice %218 {offsets = [0, 0], sizes = [4, 32], strides = [1, 1]} : vector<4x128xf32> to vector<4x32xf32>
    %221 = vector.extract_strided_slice %218 {offsets = [0, 32], sizes = [4, 32], strides = [1, 1]} : vector<4x128xf32> to vector<4x32xf32>
    %222 = vector.extract_strided_slice %219 {offsets = [0, 64], sizes = [4, 32], strides = [1, 1]} : vector<4x128xf32> to vector<4x32xf32>
    %223 = vector.extract_strided_slice %218 {offsets = [0, 96], sizes = [4, 32], strides = [1, 1]} : vector<4x128xf32> to vector<4x32xf32>
    %224 = arith.mulf %221, %208 : vector<4x32xf32>
    %225 = arith.mulf %220, %222 : vector<4x32xf32>
    %226 = arith.addf %224, %225 : vector<4x32xf32>
    %227 = math.tanh %226 : vector<4x32xf32>
    %228 = arith.mulf %223, %227 : vector<4x32xf32>
    %229 = vector.extract_strided_slice %5 {offsets = [12, 128], sizes = [4, 128], strides = [1, 1]} : vector<32x256xf32> to vector<4x128xf32>
    %cst_37 = arith.constant dense<0.000000e+00> : vector<4x128xf32>
    %230 = tpu.matmul %228, %154, %cst_37 {dimension_numbers = #tpu.dot_dimension_numbers<[1], [0], [0], [1], [0, 0, 1, 1], [], []>} : vector<4x32xf32>, vector<32x128xf32>, vector<4x128xf32> -> vector<4x128xf32>
    %231 = arith.addf %229, %230 : vector<4x128xf32>
    %232 = arith.negf %231 : vector<4x128xf32>
    %233 = math.exp %232 : vector<4x128xf32>
    %cst_38 = arith.constant 1.000000e+00 : f32
    %234 = vector.broadcast %cst_38 : f32 to vector<4x128xf32>
    %235 = arith.addf %234, %233 : vector<4x128xf32>
    %236 = arith.divf %234, %235 : vector<4x128xf32>
    %237 = math.tanh %231 : vector<4x128xf32>
    %238 = vector.extract_strided_slice %236 {offsets = [0, 0], sizes = [4, 32], strides = [1, 1]} : vector<4x128xf32> to vector<4x32xf32>
    %239 = vector.extract_strided_slice %236 {offsets = [0, 32], sizes = [4, 32], strides = [1, 1]} : vector<4x128xf32> to vector<4x32xf32>
    %240 = vector.extract_strided_slice %237 {offsets = [0, 64], sizes = [4, 32], strides = [1, 1]} : vector<4x128xf32> to vector<4x32xf32>
    %241 = vector.extract_strided_slice %236 {offsets = [0, 96], sizes = [4, 32], strides = [1, 1]} : vector<4x128xf32> to vector<4x32xf32>
    %242 = arith.mulf %239, %226 : vector<4x32xf32>
    %243 = arith.mulf %238, %240 : vector<4x32xf32>
    %244 = arith.addf %242, %243 : vector<4x32xf32>
    %245 = math.tanh %244 : vector<4x32xf32>
    %246 = arith.mulf %241, %245 : vector<4x32xf32>
    %247 = vector.extract_strided_slice %5 {offsets = [8, 128], sizes = [4, 128], strides = [1, 1]} : vector<32x256xf32> to vector<4x128xf32>
    %cst_39 = arith.constant dense<0.000000e+00> : vector<4x128xf32>
    %248 = tpu.matmul %246, %154, %cst_39 {dimension_numbers = #tpu.dot_dimension_numbers<[1], [0], [0], [1], [0, 0, 1, 1], [], []>} : vector<4x32xf32>, vector<32x128xf32>, vector<4x128xf32> -> vector<4x128xf32>
    %249 = arith.addf %247, %248 : vector<4x128xf32>
    %250 = arith.negf %249 : vector<4x128xf32>
    %251 = math.exp %250 : vector<4x128xf32>
    %cst_40 = arith.constant 1.000000e+00 : f32
    %252 = vector.broadcast %cst_40 : f32 to vector<4x128xf32>
    %253 = arith.addf %252, %251 : vector<4x128xf32>
    %254 = arith.divf %252, %253 : vector<4x128xf32>
    %255 = math.tanh %249 : vector<4x128xf32>
    %256 = vector.extract_strided_slice %254 {offsets = [0, 0], sizes = [4, 32], strides = [1, 1]} : vector<4x128xf32> to vector<4x32xf32>
    %257 = vector.extract_strided_slice %254 {offsets = [0, 32], sizes = [4, 32], strides = [1, 1]} : vector<4x128xf32> to vector<4x32xf32>
    %258 = vector.extract_strided_slice %255 {offsets = [0, 64], sizes = [4, 32], strides = [1, 1]} : vector<4x128xf32> to vector<4x32xf32>
    %259 = vector.extract_strided_slice %254 {offsets = [0, 96], sizes = [4, 32], strides = [1, 1]} : vector<4x128xf32> to vector<4x32xf32>
    %260 = arith.mulf %257, %244 : vector<4x32xf32>
    %261 = arith.mulf %256, %258 : vector<4x32xf32>
    %262 = arith.addf %260, %261 : vector<4x32xf32>
    %263 = math.tanh %262 : vector<4x32xf32>
    %264 = arith.mulf %259, %263 : vector<4x32xf32>
    %265 = vector.extract_strided_slice %5 {offsets = [4, 128], sizes = [4, 128], strides = [1, 1]} : vector<32x256xf32> to vector<4x128xf32>
    %cst_41 = arith.constant dense<0.000000e+00> : vector<4x128xf32>
    %266 = tpu.matmul %264, %154, %cst_41 {dimension_numbers = #tpu.dot_dimension_numbers<[1], [0], [0], [1], [0, 0, 1, 1], [], []>} : vector<4x32xf32>, vector<32x128xf32>, vector<4x128xf32> -> vector<4x128xf32>
    %267 = arith.addf %265, %266 : vector<4x128xf32>
    %268 = arith.negf %267 : vector<4x128xf32>
    %269 = math.exp %268 : vector<4x128xf32>
    %cst_42 = arith.constant 1.000000e+00 : f32
    %270 = vector.broadcast %cst_42 : f32 to vector<4x128xf32>
    %271 = arith.addf %270, %269 : vector<4x128xf32>
    %272 = arith.divf %270, %271 : vector<4x128xf32>
    %273 = math.tanh %267 : vector<4x128xf32>
    %274 = vector.extract_strided_slice %272 {offsets = [0, 0], sizes = [4, 32], strides = [1, 1]} : vector<4x128xf32> to vector<4x32xf32>
    %275 = vector.extract_strided_slice %272 {offsets = [0, 32], sizes = [4, 32], strides = [1, 1]} : vector<4x128xf32> to vector<4x32xf32>
    %276 = vector.extract_strided_slice %273 {offsets = [0, 64], sizes = [4, 32], strides = [1, 1]} : vector<4x128xf32> to vector<4x32xf32>
    %277 = vector.extract_strided_slice %272 {offsets = [0, 96], sizes = [4, 32], strides = [1, 1]} : vector<4x128xf32> to vector<4x32xf32>
    %278 = arith.mulf %275, %262 : vector<4x32xf32>
    %279 = arith.mulf %274, %276 : vector<4x32xf32>
    %280 = arith.addf %278, %279 : vector<4x32xf32>
    %281 = math.tanh %280 : vector<4x32xf32>
    %282 = arith.mulf %277, %281 : vector<4x32xf32>
    %283 = vector.extract_strided_slice %5 {offsets = [0, 128], sizes = [4, 128], strides = [1, 1]} : vector<32x256xf32> to vector<4x128xf32>
    %cst_43 = arith.constant dense<0.000000e+00> : vector<4x128xf32>
    %284 = tpu.matmul %282, %154, %cst_43 {dimension_numbers = #tpu.dot_dimension_numbers<[1], [0], [0], [1], [0, 0, 1, 1], [], []>} : vector<4x32xf32>, vector<32x128xf32>, vector<4x128xf32> -> vector<4x128xf32>
    %285 = arith.addf %283, %284 : vector<4x128xf32>
    %286 = arith.negf %285 : vector<4x128xf32>
    %287 = math.exp %286 : vector<4x128xf32>
    %cst_44 = arith.constant 1.000000e+00 : f32
    %288 = vector.broadcast %cst_44 : f32 to vector<4x128xf32>
    %289 = arith.addf %288, %287 : vector<4x128xf32>
    %290 = arith.divf %288, %289 : vector<4x128xf32>
    %291 = math.tanh %285 : vector<4x128xf32>
    %292 = vector.extract_strided_slice %290 {offsets = [0, 0], sizes = [4, 32], strides = [1, 1]} : vector<4x128xf32> to vector<4x32xf32>
    %293 = vector.extract_strided_slice %290 {offsets = [0, 32], sizes = [4, 32], strides = [1, 1]} : vector<4x128xf32> to vector<4x32xf32>
    %294 = vector.extract_strided_slice %291 {offsets = [0, 64], sizes = [4, 32], strides = [1, 1]} : vector<4x128xf32> to vector<4x32xf32>
    %295 = vector.extract_strided_slice %290 {offsets = [0, 96], sizes = [4, 32], strides = [1, 1]} : vector<4x128xf32> to vector<4x32xf32>
    %296 = arith.mulf %293, %280 : vector<4x32xf32>
    %297 = arith.mulf %292, %294 : vector<4x32xf32>
    %298 = arith.addf %296, %297 : vector<4x32xf32>
    %299 = math.tanh %298 : vector<4x32xf32>
    %300 = arith.mulf %295, %299 : vector<4x32xf32>
    %301 = tpu.concatenate %300, %282, %264, %246, %228, %210, %192, %174 in 0 : vector<4x32xf32>, vector<4x32xf32>, vector<4x32xf32>, vector<4x32xf32>, vector<4x32xf32>, vector<4x32xf32>, vector<4x32xf32>, vector<4x32xf32> -> vector<32x32xf32>
    %302 = tpu.concatenate %153, %301 in 1 : vector<32x32xf32>, vector<32x32xf32> -> vector<32x64xf32>
    %c0_45 = arith.constant 0 : index
    %c0_46 = arith.constant 0 : index
    %303 = vector.load %arg5[%c0_45, %c0_46] : memref<64x256xf32, #tpu.memory_space<vmem>>, vector<64x256xf32>
    %cst_47 = arith.constant dense<0.000000e+00> : vector<32x256xf32>
    %304 = tpu.matmul %302, %303, %cst_47 {dimension_numbers = #tpu.dot_dimension_numbers<[1], [0], [0], [1], [0, 0, 1, 1], [], []>} : vector<32x64xf32>, vector<64x256xf32>, vector<32x256xf32> -> vector<32x256xf32>
    %c0_48 = arith.constant 0 : index
    %c0_49 = arith.constant 0 : index
    %305 = vector.load %arg8[%c0_48, %c0_49] : memref<1x256xf32, #tpu.memory_space<vmem>>, vector<1x256xf32>
    %306 = vector.broadcast %305 : vector<1x256xf32> to vector<32x256xf32>
    %307 = arith.addf %304, %306 : vector<32x256xf32>
    %c0_50 = arith.constant 0 : index
    %c0_51 = arith.constant 0 : index
    %308 = vector.load %arg6[%c0_50, %c0_51] : memref<32x128xf32, #tpu.memory_space<vmem>>, vector<32x128xf32>
    %cst_52 = arith.constant 0.000000e+00 : f32
    %309 = vector.broadcast %cst_52 : f32 to vector<4x32xf32>
    %cst_53 = arith.constant 0.000000e+00 : f32
    %310 = vector.broadcast %cst_53 : f32 to vector<4x32xf32>
    %311 = vector.extract_strided_slice %307 {offsets = [0, 0], sizes = [4, 128], strides = [1, 1]} : vector<32x256xf32> to vector<4x128xf32>
    %cst_54 = arith.constant dense<0.000000e+00> : vector<4x128xf32>
    %312 = tpu.matmul %309, %308, %cst_54 {dimension_numbers = #tpu.dot_dimension_numbers<[1], [0], [0], [1], [0, 0, 1, 1], [], []>} : vector<4x32xf32>, vector<32x128xf32>, vector<4x128xf32> -> vector<4x128xf32>
    %313 = arith.addf %311, %312 : vector<4x128xf32>
    %314 = arith.negf %313 : vector<4x128xf32>
    %315 = math.exp %314 : vector<4x128xf32>
    %cst_55 = arith.constant 1.000000e+00 : f32
    %316 = vector.broadcast %cst_55 : f32 to vector<4x128xf32>
    %317 = arith.addf %316, %315 : vector<4x128xf32>
    %318 = arith.divf %316, %317 : vector<4x128xf32>
    %319 = math.tanh %313 : vector<4x128xf32>
    %320 = vector.extract_strided_slice %318 {offsets = [0, 0], sizes = [4, 32], strides = [1, 1]} : vector<4x128xf32> to vector<4x32xf32>
    %321 = vector.extract_strided_slice %318 {offsets = [0, 32], sizes = [4, 32], strides = [1, 1]} : vector<4x128xf32> to vector<4x32xf32>
    %322 = vector.extract_strided_slice %319 {offsets = [0, 64], sizes = [4, 32], strides = [1, 1]} : vector<4x128xf32> to vector<4x32xf32>
    %323 = vector.extract_strided_slice %318 {offsets = [0, 96], sizes = [4, 32], strides = [1, 1]} : vector<4x128xf32> to vector<4x32xf32>
    %324 = arith.mulf %321, %310 : vector<4x32xf32>
    %325 = arith.mulf %320, %322 : vector<4x32xf32>
    %326 = arith.addf %324, %325 : vector<4x32xf32>
    %327 = math.tanh %326 : vector<4x32xf32>
    %328 = arith.mulf %323, %327 : vector<4x32xf32>
    %329 = vector.extract_strided_slice %307 {offsets = [4, 0], sizes = [4, 128], strides = [1, 1]} : vector<32x256xf32> to vector<4x128xf32>
    %cst_56 = arith.constant dense<0.000000e+00> : vector<4x128xf32>
    %330 = tpu.matmul %328, %308, %cst_56 {dimension_numbers = #tpu.dot_dimension_numbers<[1], [0], [0], [1], [0, 0, 1, 1], [], []>} : vector<4x32xf32>, vector<32x128xf32>, vector<4x128xf32> -> vector<4x128xf32>
    %331 = arith.addf %329, %330 : vector<4x128xf32>
    %332 = arith.negf %331 : vector<4x128xf32>
    %333 = math.exp %332 : vector<4x128xf32>
    %cst_57 = arith.constant 1.000000e+00 : f32
    %334 = vector.broadcast %cst_57 : f32 to vector<4x128xf32>
    %335 = arith.addf %334, %333 : vector<4x128xf32>
    %336 = arith.divf %334, %335 : vector<4x128xf32>
    %337 = math.tanh %331 : vector<4x128xf32>
    %338 = vector.extract_strided_slice %336 {offsets = [0, 0], sizes = [4, 32], strides = [1, 1]} : vector<4x128xf32> to vector<4x32xf32>
    %339 = vector.extract_strided_slice %336 {offsets = [0, 32], sizes = [4, 32], strides = [1, 1]} : vector<4x128xf32> to vector<4x32xf32>
    %340 = vector.extract_strided_slice %337 {offsets = [0, 64], sizes = [4, 32], strides = [1, 1]} : vector<4x128xf32> to vector<4x32xf32>
    %341 = vector.extract_strided_slice %336 {offsets = [0, 96], sizes = [4, 32], strides = [1, 1]} : vector<4x128xf32> to vector<4x32xf32>
    %342 = arith.mulf %339, %326 : vector<4x32xf32>
    %343 = arith.mulf %338, %340 : vector<4x32xf32>
    %344 = arith.addf %342, %343 : vector<4x32xf32>
    %345 = math.tanh %344 : vector<4x32xf32>
    %346 = arith.mulf %341, %345 : vector<4x32xf32>
    %347 = vector.extract_strided_slice %307 {offsets = [8, 0], sizes = [4, 128], strides = [1, 1]} : vector<32x256xf32> to vector<4x128xf32>
    %cst_58 = arith.constant dense<0.000000e+00> : vector<4x128xf32>
    %348 = tpu.matmul %346, %308, %cst_58 {dimension_numbers = #tpu.dot_dimension_numbers<[1], [0], [0], [1], [0, 0, 1, 1], [], []>} : vector<4x32xf32>, vector<32x128xf32>, vector<4x128xf32> -> vector<4x128xf32>
    %349 = arith.addf %347, %348 : vector<4x128xf32>
    %350 = arith.negf %349 : vector<4x128xf32>
    %351 = math.exp %350 : vector<4x128xf32>
    %cst_59 = arith.constant 1.000000e+00 : f32
    %352 = vector.broadcast %cst_59 : f32 to vector<4x128xf32>
    %353 = arith.addf %352, %351 : vector<4x128xf32>
    %354 = arith.divf %352, %353 : vector<4x128xf32>
    %355 = math.tanh %349 : vector<4x128xf32>
    %356 = vector.extract_strided_slice %354 {offsets = [0, 0], sizes = [4, 32], strides = [1, 1]} : vector<4x128xf32> to vector<4x32xf32>
    %357 = vector.extract_strided_slice %354 {offsets = [0, 32], sizes = [4, 32], strides = [1, 1]} : vector<4x128xf32> to vector<4x32xf32>
    %358 = vector.extract_strided_slice %355 {offsets = [0, 64], sizes = [4, 32], strides = [1, 1]} : vector<4x128xf32> to vector<4x32xf32>
    %359 = vector.extract_strided_slice %354 {offsets = [0, 96], sizes = [4, 32], strides = [1, 1]} : vector<4x128xf32> to vector<4x32xf32>
    %360 = arith.mulf %357, %344 : vector<4x32xf32>
    %361 = arith.mulf %356, %358 : vector<4x32xf32>
    %362 = arith.addf %360, %361 : vector<4x32xf32>
    %363 = math.tanh %362 : vector<4x32xf32>
    %364 = arith.mulf %359, %363 : vector<4x32xf32>
    %365 = vector.extract_strided_slice %307 {offsets = [12, 0], sizes = [4, 128], strides = [1, 1]} : vector<32x256xf32> to vector<4x128xf32>
    %cst_60 = arith.constant dense<0.000000e+00> : vector<4x128xf32>
    %366 = tpu.matmul %364, %308, %cst_60 {dimension_numbers = #tpu.dot_dimension_numbers<[1], [0], [0], [1], [0, 0, 1, 1], [], []>} : vector<4x32xf32>, vector<32x128xf32>, vector<4x128xf32> -> vector<4x128xf32>
    %367 = arith.addf %365, %366 : vector<4x128xf32>
    %368 = arith.negf %367 : vector<4x128xf32>
    %369 = math.exp %368 : vector<4x128xf32>
    %cst_61 = arith.constant 1.000000e+00 : f32
    %370 = vector.broadcast %cst_61 : f32 to vector<4x128xf32>
    %371 = arith.addf %370, %369 : vector<4x128xf32>
    %372 = arith.divf %370, %371 : vector<4x128xf32>
    %373 = math.tanh %367 : vector<4x128xf32>
    %374 = vector.extract_strided_slice %372 {offsets = [0, 0], sizes = [4, 32], strides = [1, 1]} : vector<4x128xf32> to vector<4x32xf32>
    %375 = vector.extract_strided_slice %372 {offsets = [0, 32], sizes = [4, 32], strides = [1, 1]} : vector<4x128xf32> to vector<4x32xf32>
    %376 = vector.extract_strided_slice %373 {offsets = [0, 64], sizes = [4, 32], strides = [1, 1]} : vector<4x128xf32> to vector<4x32xf32>
    %377 = vector.extract_strided_slice %372 {offsets = [0, 96], sizes = [4, 32], strides = [1, 1]} : vector<4x128xf32> to vector<4x32xf32>
    %378 = arith.mulf %375, %362 : vector<4x32xf32>
    %379 = arith.mulf %374, %376 : vector<4x32xf32>
    %380 = arith.addf %378, %379 : vector<4x32xf32>
    %381 = math.tanh %380 : vector<4x32xf32>
    %382 = arith.mulf %377, %381 : vector<4x32xf32>
    %383 = vector.extract_strided_slice %307 {offsets = [16, 0], sizes = [4, 128], strides = [1, 1]} : vector<32x256xf32> to vector<4x128xf32>
    %cst_62 = arith.constant dense<0.000000e+00> : vector<4x128xf32>
    %384 = tpu.matmul %382, %308, %cst_62 {dimension_numbers = #tpu.dot_dimension_numbers<[1], [0], [0], [1], [0, 0, 1, 1], [], []>} : vector<4x32xf32>, vector<32x128xf32>, vector<4x128xf32> -> vector<4x128xf32>
    %385 = arith.addf %383, %384 : vector<4x128xf32>
    %386 = arith.negf %385 : vector<4x128xf32>
    %387 = math.exp %386 : vector<4x128xf32>
    %cst_63 = arith.constant 1.000000e+00 : f32
    %388 = vector.broadcast %cst_63 : f32 to vector<4x128xf32>
    %389 = arith.addf %388, %387 : vector<4x128xf32>
    %390 = arith.divf %388, %389 : vector<4x128xf32>
    %391 = math.tanh %385 : vector<4x128xf32>
    %392 = vector.extract_strided_slice %390 {offsets = [0, 0], sizes = [4, 32], strides = [1, 1]} : vector<4x128xf32> to vector<4x32xf32>
    %393 = vector.extract_strided_slice %390 {offsets = [0, 32], sizes = [4, 32], strides = [1, 1]} : vector<4x128xf32> to vector<4x32xf32>
    %394 = vector.extract_strided_slice %391 {offsets = [0, 64], sizes = [4, 32], strides = [1, 1]} : vector<4x128xf32> to vector<4x32xf32>
    %395 = vector.extract_strided_slice %390 {offsets = [0, 96], sizes = [4, 32], strides = [1, 1]} : vector<4x128xf32> to vector<4x32xf32>
    %396 = arith.mulf %393, %380 : vector<4x32xf32>
    %397 = arith.mulf %392, %394 : vector<4x32xf32>
    %398 = arith.addf %396, %397 : vector<4x32xf32>
    %399 = math.tanh %398 : vector<4x32xf32>
    %400 = arith.mulf %395, %399 : vector<4x32xf32>
    %401 = vector.extract_strided_slice %307 {offsets = [20, 0], sizes = [4, 128], strides = [1, 1]} : vector<32x256xf32> to vector<4x128xf32>
    %cst_64 = arith.constant dense<0.000000e+00> : vector<4x128xf32>
    %402 = tpu.matmul %400, %308, %cst_64 {dimension_numbers = #tpu.dot_dimension_numbers<[1], [0], [0], [1], [0, 0, 1, 1], [], []>} : vector<4x32xf32>, vector<32x128xf32>, vector<4x128xf32> -> vector<4x128xf32>
    %403 = arith.addf %401, %402 : vector<4x128xf32>
    %404 = arith.negf %403 : vector<4x128xf32>
    %405 = math.exp %404 : vector<4x128xf32>
    %cst_65 = arith.constant 1.000000e+00 : f32
    %406 = vector.broadcast %cst_65 : f32 to vector<4x128xf32>
    %407 = arith.addf %406, %405 : vector<4x128xf32>
    %408 = arith.divf %406, %407 : vector<4x128xf32>
    %409 = math.tanh %403 : vector<4x128xf32>
    %410 = vector.extract_strided_slice %408 {offsets = [0, 0], sizes = [4, 32], strides = [1, 1]} : vector<4x128xf32> to vector<4x32xf32>
    %411 = vector.extract_strided_slice %408 {offsets = [0, 32], sizes = [4, 32], strides = [1, 1]} : vector<4x128xf32> to vector<4x32xf32>
    %412 = vector.extract_strided_slice %409 {offsets = [0, 64], sizes = [4, 32], strides = [1, 1]} : vector<4x128xf32> to vector<4x32xf32>
    %413 = vector.extract_strided_slice %408 {offsets = [0, 96], sizes = [4, 32], strides = [1, 1]} : vector<4x128xf32> to vector<4x32xf32>
    %414 = arith.mulf %411, %398 : vector<4x32xf32>
    %415 = arith.mulf %410, %412 : vector<4x32xf32>
    %416 = arith.addf %414, %415 : vector<4x32xf32>
    %417 = math.tanh %416 : vector<4x32xf32>
    %418 = arith.mulf %413, %417 : vector<4x32xf32>
    %419 = vector.extract_strided_slice %307 {offsets = [24, 0], sizes = [4, 128], strides = [1, 1]} : vector<32x256xf32> to vector<4x128xf32>
    %cst_66 = arith.constant dense<0.000000e+00> : vector<4x128xf32>
    %420 = tpu.matmul %418, %308, %cst_66 {dimension_numbers = #tpu.dot_dimension_numbers<[1], [0], [0], [1], [0, 0, 1, 1], [], []>} : vector<4x32xf32>, vector<32x128xf32>, vector<4x128xf32> -> vector<4x128xf32>
    %421 = arith.addf %419, %420 : vector<4x128xf32>
    %422 = arith.negf %421 : vector<4x128xf32>
    %423 = math.exp %422 : vector<4x128xf32>
    %cst_67 = arith.constant 1.000000e+00 : f32
    %424 = vector.broadcast %cst_67 : f32 to vector<4x128xf32>
    %425 = arith.addf %424, %423 : vector<4x128xf32>
    %426 = arith.divf %424, %425 : vector<4x128xf32>
    %427 = math.tanh %421 : vector<4x128xf32>
    %428 = vector.extract_strided_slice %426 {offsets = [0, 0], sizes = [4, 32], strides = [1, 1]} : vector<4x128xf32> to vector<4x32xf32>
    %429 = vector.extract_strided_slice %426 {offsets = [0, 32], sizes = [4, 32], strides = [1, 1]} : vector<4x128xf32> to vector<4x32xf32>
    %430 = vector.extract_strided_slice %427 {offsets = [0, 64], sizes = [4, 32], strides = [1, 1]} : vector<4x128xf32> to vector<4x32xf32>
    %431 = vector.extract_strided_slice %426 {offsets = [0, 96], sizes = [4, 32], strides = [1, 1]} : vector<4x128xf32> to vector<4x32xf32>
    %432 = arith.mulf %429, %416 : vector<4x32xf32>
    %433 = arith.mulf %428, %430 : vector<4x32xf32>
    %434 = arith.addf %432, %433 : vector<4x32xf32>
    %435 = math.tanh %434 : vector<4x32xf32>
    %436 = arith.mulf %431, %435 : vector<4x32xf32>
    %437 = vector.extract_strided_slice %307 {offsets = [28, 0], sizes = [4, 128], strides = [1, 1]} : vector<32x256xf32> to vector<4x128xf32>
    %cst_68 = arith.constant dense<0.000000e+00> : vector<4x128xf32>
    %438 = tpu.matmul %436, %308, %cst_68 {dimension_numbers = #tpu.dot_dimension_numbers<[1], [0], [0], [1], [0, 0, 1, 1], [], []>} : vector<4x32xf32>, vector<32x128xf32>, vector<4x128xf32> -> vector<4x128xf32>
    %439 = arith.addf %437, %438 : vector<4x128xf32>
    %440 = arith.negf %439 : vector<4x128xf32>
    %441 = math.exp %440 : vector<4x128xf32>
    %cst_69 = arith.constant 1.000000e+00 : f32
    %442 = vector.broadcast %cst_69 : f32 to vector<4x128xf32>
    %443 = arith.addf %442, %441 : vector<4x128xf32>
    %444 = arith.divf %442, %443 : vector<4x128xf32>
    %445 = math.tanh %439 : vector<4x128xf32>
    %446 = vector.extract_strided_slice %444 {offsets = [0, 0], sizes = [4, 32], strides = [1, 1]} : vector<4x128xf32> to vector<4x32xf32>
    %447 = vector.extract_strided_slice %444 {offsets = [0, 32], sizes = [4, 32], strides = [1, 1]} : vector<4x128xf32> to vector<4x32xf32>
    %448 = vector.extract_strided_slice %445 {offsets = [0, 64], sizes = [4, 32], strides = [1, 1]} : vector<4x128xf32> to vector<4x32xf32>
    %449 = vector.extract_strided_slice %444 {offsets = [0, 96], sizes = [4, 32], strides = [1, 1]} : vector<4x128xf32> to vector<4x32xf32>
    %450 = arith.mulf %447, %434 : vector<4x32xf32>
    %451 = arith.mulf %446, %448 : vector<4x32xf32>
    %452 = arith.addf %450, %451 : vector<4x32xf32>
    %453 = math.tanh %452 : vector<4x32xf32>
    %454 = arith.mulf %449, %453 : vector<4x32xf32>
    %c0_70 = arith.constant 0 : index
    %c0_71 = arith.constant 0 : index
    %455 = vector.load %arg7[%c0_70, %c0_71] : memref<32x128xf32, #tpu.memory_space<vmem>>, vector<32x128xf32>
    %cst_72 = arith.constant 0.000000e+00 : f32
    %456 = vector.broadcast %cst_72 : f32 to vector<4x32xf32>
    %cst_73 = arith.constant 0.000000e+00 : f32
    %457 = vector.broadcast %cst_73 : f32 to vector<4x32xf32>
    %458 = vector.extract_strided_slice %307 {offsets = [28, 128], sizes = [4, 128], strides = [1, 1]} : vector<32x256xf32> to vector<4x128xf32>
    %cst_74 = arith.constant dense<0.000000e+00> : vector<4x128xf32>
    %459 = tpu.matmul %456, %455, %cst_74 {dimension_numbers = #tpu.dot_dimension_numbers<[1], [0], [0], [1], [0, 0, 1, 1], [], []>} : vector<4x32xf32>, vector<32x128xf32>, vector<4x128xf32> -> vector<4x128xf32>
    %460 = arith.addf %458, %459 : vector<4x128xf32>
    %461 = arith.negf %460 : vector<4x128xf32>
    %462 = math.exp %461 : vector<4x128xf32>
    %cst_75 = arith.constant 1.000000e+00 : f32
    %463 = vector.broadcast %cst_75 : f32 to vector<4x128xf32>
    %464 = arith.addf %463, %462 : vector<4x128xf32>
    %465 = arith.divf %463, %464 : vector<4x128xf32>
    %466 = math.tanh %460 : vector<4x128xf32>
    %467 = vector.extract_strided_slice %465 {offsets = [0, 0], sizes = [4, 32], strides = [1, 1]} : vector<4x128xf32> to vector<4x32xf32>
    %468 = vector.extract_strided_slice %465 {offsets = [0, 32], sizes = [4, 32], strides = [1, 1]} : vector<4x128xf32> to vector<4x32xf32>
    %469 = vector.extract_strided_slice %466 {offsets = [0, 64], sizes = [4, 32], strides = [1, 1]} : vector<4x128xf32> to vector<4x32xf32>
    %470 = vector.extract_strided_slice %465 {offsets = [0, 96], sizes = [4, 32], strides = [1, 1]} : vector<4x128xf32> to vector<4x32xf32>
    %471 = arith.mulf %468, %457 : vector<4x32xf32>
    %472 = arith.mulf %467, %469 : vector<4x32xf32>
    %473 = arith.addf %471, %472 : vector<4x32xf32>
    %474 = math.tanh %473 : vector<4x32xf32>
    %475 = arith.mulf %470, %474 : vector<4x32xf32>
    %476 = tpu.concatenate %454, %475 in 1 : vector<4x32xf32>, vector<4x32xf32> -> vector<4x64xf32>
    %c0_76 = arith.constant 0 : index
    %c0_77 = arith.constant 0 : index
    %477 = vector.load %arg9[%c0_76, %c0_77] : memref<64x4xf32, #tpu.memory_space<vmem>>, vector<64x4xf32>
    %cst_78 = arith.constant dense<0.000000e+00> : vector<4x4xf32>
    %478 = tpu.matmul %476, %477, %cst_78 {dimension_numbers = #tpu.dot_dimension_numbers<[1], [0], [0], [1], [0, 0, 1, 1], [], []>} : vector<4x64xf32>, vector<64x4xf32>, vector<4x4xf32> -> vector<4x4xf32>
    %c0_79 = arith.constant 0 : index
    %c0_80 = arith.constant 0 : index
    %479 = vector.load %arg10[%c0_79, %c0_80] : memref<1x4xf32, #tpu.memory_space<vmem>>, vector<1x4xf32>
    %480 = vector.broadcast %479 : vector<1x4xf32> to vector<4x4xf32>
    %481 = arith.addf %478, %480 : vector<4x4xf32>
    %c0_81 = arith.constant 0 : index
    %c0_82 = arith.constant 0 : index
    %482 = vector.load %arg11[%c0_81, %c0_82] : memref<4x4xf32, #tpu.memory_space<vmem>>, vector<4x4xf32>
    tpu.vector_store %arg11[%c0_81, %c0_82], %481 {strides = array<i32>} : memref<4x4xf32, #tpu.memory_space<vmem>>, vector<4x4xf32>,
    return
  }
}

</mosaic_0001>

<bundles_post_ra>
// kernel: text_rnn_forward.1
= control target key start
LH: loop header
LB: loop body
LE: loop exit
PB: predicated region body
PF: predicated region fallthrough
CT: control target
= control target key end

     0   :  { %vm53_vm0 = vcmask 130048   ;;  %s2891_s0 = inlined_call_operand.vmem [shape: f32[32,16], index: 0, kind: input, shape index: {}]   ;;  %s2892_s1 = inlined_call_operand.vmem [shape: f32[16,256], index: 1, kind: input, shape index: {}]   ;;  %s2893_s2 = inlined_call_operand.vmem [shape: f32[32,128], index: 2, kind: input, shape index: {}]   ;;  %s2894_s3 = inlined_call_operand.vmem [shape: f32[32,128], index: 3, kind: input, shape index: {}]   ;;  %s2895_s4 = inlined_call_operand.vmem [shape: f32[1,256], index: 4, kind: input, shape index: {}]   ;;  %s2896_s5 = inlined_call_operand.vmem [shape: f32[64,256], index: 5, kind: input, shape index: {}]   ;;  %s2897_s6 = inlined_call_operand.vmem [shape: f32[32,128], index: 6, kind: input, shape index: {}]   ;;  %s2898_s7 = inlined_call_operand.vmem [shape: f32[32,128], index: 7, kind: input, shape index: {}]   ;;  %s2899_s8 = inlined_call_operand.vmem [shape: f32[1,256], index: 8, kind: input, shape index: {}]   ;;  %s2900_s9 = inlined_call_operand.vmem [shape: f32[64,4], index: 9, kind: input, shape index: {}]   ;;  %s2901_s10 = inlined_call_operand.vmem [shape: f32[1,4], index: 10, kind: input, shape index: {}]   ;;  %s2902_s11 = inlined_call_operand.hbm [shape: f32[4,4], index: 11, kind: output, shape index: {}]  }
   0x1   :  { %v2370_v0 = vld [vmem:[%s2893_s2 + $0x18] sm:$0xff]  ;;  %v2375_v1 = vld [vmem:[%s2893_s2 + $0x10] sm:$0xff]  ;;  %v43_v3 = vld [vmem:[%s2892_s1] sm:$0xff] }
   0x2   :  { %144 = vmatpush.msra.mxu2 %v2370_v0  ;;  %v45_v2 = vld [vmem:[%s2892_s1 + $0x10] sm:$0xff]  ;;  %207 = vmatpush.msra.mxu3 %v2370_v0  ;;  %v2388_v4 = vld [vmem:[%s2893_s2 + $0x8] sm:$0xff]  ;;  %v2393_v5 = vld [vmem:[%s2891_s0] sm:$0xff] }
   0x3   :  { %80 = vmatpush.msra.mxu0 %v45_v2 }
   0x4   :  { %145 = vmatpush.msra.mxu2 %v2375_v1  ;;  %208 = vmatpush.msra.mxu3 %v2375_v1 }
   0x5   :  { %16 = vsyncpa [#allocation3], 0  ;;  %v2400_v6 = vld [vmem:[%s2893_s2] sm:$0xff]  ;;  %81 = vmatpush.msra.mxu0 %v43_v3  ;;  %v2303_v7 = vmov 0.0   ;;  %s2304_s13 = smov 64   ;;  %vm128_vm5 = vcmask 261120  }
   0x6   :  { %146 = vmatpush.msra.mxu2 %v2388_v4  ;;  %2009 = vmatmul.msk.f32.vlgmr.msra.gmra.mxu0 %vm53_vm0, %v2393_v5  ;;  %v2424_v8 = vld [vmem:[%s2895_s4] sm:$0x3]  ;;  %s2305_s4 = smov 32   ;;  %v2452_v2 = vld [vmem:[%s2891_s0 + $0x8] sm:$0xff]  ;;  %s2306_s26 = smov [#allocation2]  }
   0x7   :  { %209 = vmatpush.msra.mxu3 %v2388_v4  ;;  %v2427_v9 = vperm.slane %v2424_v8, 0  ;;  %s2000_s27 = sshll.u32 %s2902_s11, 4  ;;  %s2001_s27 = int_to_ptr.hbm [resolvable:$true] %s2000_s27 }
   0x8   :  { %147 = vmatpush.msra.mxu2 %v2400_v6 }
   0x9   :  { %148 = vmatmul.f32.vlgmr.msra.gmra.mxu2 %v2303_v7  ;;  %210 = vmatpush.msra.mxu3 %v2400_v6 }
   0xa   :  { %277 = vmatpush.msrb.mxu2 %v2370_v0 }
   0xb   :  { %343 = vmatpush.msrb.mxu3 %v2370_v0 }
   0xc   :  { %278 = vmatpush.msrb.mxu2 %v2375_v1 }
   0xd   :  { %344 = vmatpush.msrb.mxu3 %v2375_v1 }
   0xe   :  { %279 = vmatpush.msrb.mxu2 %v2388_v4  ;;  %2010 = vmatmul.msk.f32.gmra.mxu0 %vm53_vm0, %v2452_v2 }
   0xf   :  { %345 = vmatpush.msrb.mxu3 %v2388_v4 }
  0x10   :  { %280 = vmatpush.msrb.mxu2 %v2400_v6 }
  0x11   :  { %346 = vmatpush.msrb.mxu3 %v2400_v6 }
  0x12   :  { %413 = vmatpush.msra.mxu2 %v2370_v0 }
  0x14   :  { %414 = vmatpush.msra.mxu2 %v2375_v1 }
  0x16   :  { %415 = vmatpush.msra.mxu2 %v2388_v4 }
  0x18   :  { %416 = vmatpush.msra.mxu2 %v2400_v6 }
  0x83   :  { %v83_v10 = vpop.f32.mrf.mxu0 }
  0x84   :  { %v84_v11 = vadd.f32 %v83_v10, %v2427_v9 }
  0x8b   :  { %v86_v10 = vpop.f32.mrf.mxu0 }
  0x8c   :  { %v149_v12 = vpop.f32.mrf.mxu2 }
  0x8d   :  { %v152_v13 = vadd.f32 %v149_v12, %v84_v11 }
  0x8f   :  { %2077 = vtanh.f32 %v152_v13  ;;  %v2017_v15 = vmul.f32 -1.442695, %v152_v13 }
  0x91   :  { %2079 = vpow2.f32 %v2017_v15 }
  0x95   :  { %v2078_v14 = vpop.eup %2077 }
  0x96   :  { %175 = vrot.lane.b32.xlu0 %v2078_v14, %s2304_s13 }
  0x97   :  { %v2080_v16 = vpop.eup %2079 }
  0x98   :  { %v156_v17 = vadd.f32 1.0, %v2080_v16 }
  0x9a   :  { %2081 = vrcp.f32 %v156_v17  ;;  %v168_v23 = vand.u32 2147483648, %v156_v17  ;;  %vm162_vm2 = vweird.f32 %v156_v17  ;;  %v166_v24 = vand.u32 2147483647, %v156_v17 }
  0x9c   :  { %v169_v26 = vor.u32 1.1754944e-38, %v168_v23  ;;  %vm167_vm4 = vcmp.eq.f32.partialorder %v166_v24, 8.507059e+37 }
  0xa0   :  { %v2082_v18 = vpop.eup %2081 }
  0xa1   :  { %v158_v19 = vmul.f32 %v2082_v18, %v156_v17  ;;  %vm163_vm1 = vweird.f32 %v2082_v18 }
  0xa2   :  { %vm164_vm3 = vmor %vm162_vm2, %vm163_vm1 }
  0xa3   :  { %v159_v20 = vsub.f32 1.0, %v158_v19 }
  0xa5   :  { %v160_v21 = vmul.f32 %v2082_v18, %v159_v20 }
  0xa7   :  { %v161_v22 = vadd.f32 %v2082_v18, %v160_v21 }
  0xa9   :  { %v165_v25 = vsel %vm164_vm3, %v2082_v18, %v161_v22 }
  0xaa   :  { %v170_v28 = vsel %vm167_vm4, %v169_v26, %v165_v25 }
  0xab   :  { %v173_v30 = vmul.f32 0.0, %v170_v28 }
 0x108   :  { %v176_v27 = vpop.permute.xlu0 %175 }
 0x109   :  { %v178_v29 = vmul.f32 %v176_v27, %v170_v28 }
 0x10b   :  { %180 = vrot.lane.b32.xlu0 %v178_v29, %s2305_s4 }
 0x17d   :  { %v181_v31 = vpop.permute.xlu0 %180 }
 0x17e   :  { %v183_v32 = vadd.f32 %v181_v31, %v173_v30 }
 0x180   :  { %2083 = vtanh.f32 %v183_v32  ;;  %v240_v56 = vrot.slane %v183_v32, 4 }
 0x186   :  { %v2084_v33 = vpop.eup %2083 }
 0x187   :  { %186 = vrot.lane.b32.xlu1 %v2084_v33, %s2304_s13 }
 0x1f9   :  { %v187_v34 = vpop.permute.xlu1 %186 }
 0x1fa   :  { %v2433_v35 = vmul.f32 %v187_v34, %v170_v28 }
 0x1fc   :  { %191 = vrot.lane.b32.xlu1 %v2433_v35, %s2305_s4 }
 0x26e   :  { %v192_v36 = vpop.permute.xlu1 %191 }
 0x26f   :  { %2018 = vmatmul.msk.f32.vlgmr.msra.gmra.mxu3 %vm128_vm5, %v192_v36 }
 0x270   :  { %479 = vmatpush.msra.mxu3 %v2370_v0 }
 0x272   :  { %480 = vmatpush.msra.mxu3 %v2375_v1 }
 0x274   :  { %481 = vmatpush.msra.mxu3 %v2388_v4 }
 0x276   :  { %482 = vmatpush.msra.mxu3 %v2400_v6 }
 0x2f2   :  { %v212_v37 = vpop.f32.mrf.mxu3 }
 0x2f3   :  { %v216_v38 = vrot.slane %v212_v37, 4 }
 0x2f5   :  { %v218_v39 = vadd.f32 %v216_v38, %v84_v11  ;;  %v87_v11 = vadd.f32 %v86_v10, %v2427_v9 }
 0x2f7   :  { %2085 = vtanh.f32 %v218_v39  ;;  %v2019_v41 = vmul.f32 -1.442695, %v218_v39 }
 0x2f9   :  { %2087 = vpow2.f32 %v2019_v41 }
 0x2fd   :  { %v2086_v40 = vpop.eup %2085 }
 0x2fe   :  { %244 = vrot.lane.b32.xlu2 %v2086_v40, %s2304_s13 }
 0x2ff   :  { %v2088_v42 = vpop.eup %2087 }
 0x300   :  { %v222_v43 = vadd.f32 1.0, %v2088_v42 }
 0x302   :  { %2089 = vrcp.f32 %v222_v43  ;;  %v234_v49 = vand.u32 2147483648, %v222_v43  ;;  %vm228_vm7 = vweird.f32 %v222_v43  ;;  %v232_v50 = vand.u32 2147483647, %v222_v43 }
 0x304   :  { %v235_v52 = vor.u32 1.1754944e-38, %v234_v49  ;;  %vm233_vm9 = vcmp.eq.f32.partialorder %v232_v50, 8.507059e+37 }
 0x308   :  { %v2090_v44 = vpop.eup %2089 }
 0x309   :  { %v224_v45 = vmul.f32 %v2090_v44, %v222_v43  ;;  %vm229_vm6 = vweird.f32 %v2090_v44 }
 0x30a   :  { %vm230_vm8 = vmor %vm228_vm7, %vm229_vm6 }
 0x30b   :  { %v225_v46 = vsub.f32 1.0, %v224_v45 }
 0x30d   :  { %v226_v47 = vmul.f32 %v2090_v44, %v225_v46 }
 0x30f   :  { %v227_v48 = vadd.f32 %v2090_v44, %v226_v47 }
 0x311   :  { %v231_v51 = vsel %vm230_vm8, %v2090_v44, %v227_v48 }
 0x312   :  { %v236_v54 = vsel %vm233_vm9, %v235_v52, %v231_v51 }
 0x313   :  { %v242_v57 = vmul.f32 %v240_v56, %v236_v54 }
 0x358   :  { %v245_v53 = vpop.permute.xlu2 %244 }
 0x359   :  { %v247_v55 = vmul.f32 %v245_v53, %v236_v54 }
 0x35b   :  { %249 = vrot.lane.b32.xlu2 %v247_v55, %s2305_s4 }
 0x3b5   :  { %v250_v58 = vpop.permute.xlu2 %249 }
 0x3b6   :  { %v252_v59 = vadd.f32 %v250_v58, %v242_v57 }
 0x3b8   :  { %2091 = vtanh.f32 %v252_v59  ;;  %v307_v30 = vrot.slane %v252_v59, 4 }
 0x3be   :  { %v2092_v60 = vpop.eup %2091 }
 0x3bf   :  { %255 = vrot.lane.b32.xlu0 %v2092_v60, %s2304_s13 }
 0x431   :  { %v256_v61 = vpop.permute.xlu0 %255 }
 0x432   :  { %v2445_v62 = vmul.f32 %v256_v61, %v236_v54 }
 0x434   :  { %v260_v63 = vrot.slane %v2445_v62, 4 }
 0x436   :  { %261 = vrot.lane.b32.xlu1 %v260_v63, %s2305_s4  ;;  %v2484_v63 = vld [vmem:[%s2891_s0 + $0x10] sm:$0xff] }
 0x437   :  { %2011 = vmatmul.msk.f32.gmra.mxu0 %vm53_vm0, %v2484_v63 }
 0x4a8   :  { %v262_v3 = vpop.permute.xlu1 %261 }
 0x4a9   :  { %2020 = vmatmul.msk.f32.vlgmr.msrb.gmra.mxu2 %vm128_vm5, %v262_v3 }
 0x4aa   :  { %549 = vmatpush.msrb.mxu2 %v2370_v0 }
 0x4ac   :  { %550 = vmatpush.msrb.mxu2 %v2375_v1 }
 0x4ae   :  { %551 = vmatpush.msrb.mxu2 %v2388_v4 }
 0x4b0   :  { %552 = vmatpush.msrb.mxu2 %v2400_v6 }
 0x4b4   :  { %v89_v10 = vpop.f32.mrf.mxu0 }
 0x52c   :  { %v282_v12 = vpop.f32.mrf.mxu2 }
 0x52d   :  { %v285_v13 = vadd.f32 %v282_v12, %v87_v11 }
 0x52f   :  { %2093 = vtanh.f32 %v285_v13  ;;  %v2021_v15 = vmul.f32 -1.442695, %v285_v13 }
 0x531   :  { %2095 = vpow2.f32 %v2021_v15 }
 0x535   :  { %v2094_v14 = vpop.eup %2093 }
 0x536   :  { %311 = vrot.lane.b32.xlu2 %v2094_v14, %s2304_s13 }
 0x537   :  { %v2096_v16 = vpop.eup %2095 }
 0x538   :  { %v289_v17 = vadd.f32 1.0, %v2096_v16 }
 0x53a   :  { %2097 = vrcp.f32 %v289_v17  ;;  %v301_v23 = vand.u32 2147483648, %v289_v17  ;;  %vm295_vm11 = vweird.f32 %v289_v17  ;;  %v299_v24 = vand.u32 2147483647, %v289_v17 }
 0x53c   :  { %v302_v26 = vor.u32 1.1754944e-38, %v301_v23  ;;  %vm300_vm13 = vcmp.eq.f32.partialorder %v299_v24, 8.507059e+37 }
 0x540   :  { %v2098_v18 = vpop.eup %2097 }
 0x541   :  { %v291_v19 = vmul.f32 %v2098_v18, %v289_v17  ;;  %vm296_vm10 = vweird.f32 %v2098_v18 }
 0x542   :  { %vm297_vm12 = vmor %vm295_vm11, %vm296_vm10 }
 0x543   :  { %v292_v20 = vsub.f32 1.0, %v291_v19 }
 0x545   :  { %v293_v21 = vmul.f32 %v2098_v18, %v292_v20 }
 0x547   :  { %v294_v22 = vadd.f32 %v2098_v18, %v293_v21 }
 0x549   :  { %v298_v25 = vsel %vm297_vm12, %v2098_v18, %v294_v22 }
 0x54a   :  { %v303_v28 = vsel %vm300_vm13, %v302_v26, %v298_v25 }
 0x54b   :  { %v309_v31 = vmul.f32 %v307_v30, %v303_v28 }
 0x590   :  { %v312_v27 = vpop.permute.xlu2 %311 }
 0x591   :  { %v314_v29 = vmul.f32 %v312_v27, %v303_v28 }
 0x593   :  { %316 = vrot.lane.b32.xlu0 %v314_v29, %s2305_s4 }
 0x605   :  { %v317_v32 = vpop.permute.xlu0 %316 }
 0x606   :  { %v319_v33 = vadd.f32 %v317_v32, %v309_v31 }
 0x608   :  { %2099 = vtanh.f32 %v319_v33  ;;  %v376_v54 = vrot.slane %v319_v33, 4 }
 0x60e   :  { %v2100_v34 = vpop.eup %2099 }
 0x60f   :  { %322 = vrot.lane.b32.xlu1 %v2100_v34, %s2304_s13 }
 0x681   :  { %v323_v36 = vpop.permute.xlu1 %322 }
 0x682   :  { %v2465_v37 = vmul.f32 %v323_v36, %v303_v28 }
 0x684   :  { %327 = vrot.lane.b32.xlu2 %v2465_v37, %s2305_s4 }
 0x6de   :  { %v328_v38 = vpop.permute.xlu2 %327 }
 0x6df   :  { %2022 = vmatmul.msk.f32.vlgmr.msrb.gmra.mxu3 %vm128_vm5, %v328_v38 }
 0x6e0   :  { %615 = vmatpush.msrb.mxu3 %v2370_v0 }
 0x6e2   :  { %616 = vmatpush.msrb.mxu3 %v2375_v1 }
 0x6e4   :  { %617 = vmatpush.msrb.mxu3 %v2388_v4 }
 0x6e6   :  { %618 = vmatpush.msrb.mxu3 %v2400_v6 }
 0x762   :  { %v348_v39 = vpop.f32.mrf.mxu3 }
 0x763   :  { %v352_v40 = vrot.slane %v348_v39, 4 }
 0x765   :  { %v354_v41 = vadd.f32 %v352_v40, %v87_v11  ;;  %v90_v11 = vadd.f32 %v89_v10, %v2427_v9 }
 0x767   :  { %2101 = vtanh.f32 %v354_v41  ;;  %v2023_v43 = vmul.f32 -1.442695, %v354_v41 }
 0x769   :  { %2103 = vpow2.f32 %v2023_v43 }
 0x76d   :  { %v2102_v42 = vpop.eup %2101 }
 0x76e   :  { %380 = vrot.lane.b32.xlu0 %v2102_v42, %s2304_s13 }
 0x76f   :  { %v2104_v44 = vpop.eup %2103 }
 0x770   :  { %v358_v45 = vadd.f32 1.0, %v2104_v44 }
 0x772   :  { %2105 = vrcp.f32 %v358_v45  ;;  %v370_v4 = vand.u32 2147483648, %v358_v45  ;;  %vm364_vm15 = vweird.f32 %v358_v45  ;;  %v368_v6 = vand.u32 2147483647, %v358_v45 }
 0x774   :  { %v371_v50 = vor.u32 1.1754944e-38, %v370_v4  ;;  %vm369_vm2 = vcmp.eq.f32.partialorder %v368_v6, 8.507059e+37 }
 0x778   :  { %v2106_v46 = vpop.eup %2105 }
 0x779   :  { %v360_v0 = vmul.f32 %v2106_v46, %v358_v45  ;;  %vm365_vm14 = vweird.f32 %v2106_v46 }
 0x77a   :  { %vm366_vm1 = vmor %vm364_vm15, %vm365_vm14 }
 0x77b   :  { %v361_v47 = vsub.f32 1.0, %v360_v0 }
 0x77d   :  { %v362_v1 = vmul.f32 %v2106_v46, %v361_v47 }
 0x77f   :  { %v363_v48 = vadd.f32 %v2106_v46, %v362_v1 }
 0x781   :  { %v367_v49 = vsel %vm366_vm1, %v2106_v46, %v363_v48 }
 0x782   :  { %v372_v52 = vsel %vm369_vm2, %v371_v50, %v367_v49 }
 0x783   :  { %v378_v55 = vmul.f32 %v376_v54, %v372_v52 }
 0x7e0   :  { %v381_v51 = vpop.permute.xlu0 %380 }
 0x7e1   :  { %v383_v53 = vmul.f32 %v381_v51, %v372_v52 }
 0x7e3   :  { %385 = vrot.lane.b32.xlu1 %v383_v53, %s2305_s4 }
 0x855   :  { %v386_v56 = vpop.permute.xlu1 %385 }
 0x856   :  { %v388_v57 = vadd.f32 %v386_v56, %v378_v55 }
 0x858   :  { %2107 = vtanh.f32 %v388_v57  ;;  %v443_v30 = vrot.slane %v388_v57, 4 }
 0x85e   :  { %v2108_v58 = vpop.eup %2107 }
 0x85f   :  { %391 = vrot.lane.b32.xlu2 %v2108_v58, %s2304_s13 }
 0x8b9   :  { %v392_v59 = vpop.permute.xlu2 %391 }
 0x8ba   :  { %v2477_v60 = vmul.f32 %v392_v59, %v372_v52 }
 0x8bc   :  { %v396_v61 = vrot.slane %v2477_v60, 4 }
 0x8be   :  { %397 = vrot.lane.b32.xlu0 %v396_v61, %s2305_s4 }
 0x930   :  { %v398_v3 = vpop.permute.xlu0 %397 }
 0x931   :  { %2024 = vmatmul.msk.f32.vlgmr.msra.gmra.mxu2 %vm128_vm5, %v398_v3 }
 0x9b4   :  { %v418_v12 = vpop.f32.mrf.mxu2 }
 0x9b5   :  { %v421_v13 = vadd.f32 %v418_v12, %v90_v11 }
 0x9b7   :  { %2109 = vtanh.f32 %v421_v13  ;;  %v2025_v15 = vmul.f32 -1.442695, %v421_v13 }
 0x9b9   :  { %2111 = vpow2.f32 %v2025_v15 }
 0x9bd   :  { %v2110_v14 = vpop.eup %2109 }
 0x9be   :  { %447 = vrot.lane.b32.xlu1 %v2110_v14, %s2304_s13 }
 0x9bf   :  { %v2112_v16 = vpop.eup %2111 }
 0x9c0   :  { %v425_v17 = vadd.f32 1.0, %v2112_v16 }
 0x9c2   :  { %2113 = vrcp.f32 %v425_v17  ;;  %v437_v23 = vand.u32 2147483648, %v425_v17  ;;  %vm431_vm4 = vweird.f32 %v425_v17  ;;  %v435_v24 = vand.u32 2147483647, %v425_v17 }
 0x9c4   :  { %v438_v26 = vor.u32 1.1754944e-38, %v437_v23  ;;  %vm436_vm7 = vcmp.eq.f32.partialorder %v435_v24, 8.507059e+37 }
 0x9c8   :  { %v2114_v18 = vpop.eup %2113 }
 0x9c9   :  { %v427_v19 = vmul.f32 %v2114_v18, %v425_v17  ;;  %vm432_vm3 = vweird.f32 %v2114_v18 }
 0x9ca   :  { %vm433_vm6 = vmor %vm431_vm4, %vm432_vm3 }
 0x9cb   :  { %v428_v20 = vsub.f32 1.0, %v427_v19 }
 0x9cd   :  { %v429_v21 = vmul.f32 %v2114_v18, %v428_v20 }
 0x9cf   :  { %v430_v22 = vadd.f32 %v2114_v18, %v429_v21 }
 0x9d1   :  { %v434_v25 = vsel %vm433_vm6, %v2114_v18, %v430_v22 }
 0x9d2   :  { %v439_v28 = vsel %vm436_vm7, %v438_v26, %v434_v25 }
 0x9d3   :  { %v445_v31 = vmul.f32 %v443_v30, %v439_v28 }
 0xa30   :  { %v448_v27 = vpop.permute.xlu1 %447 }
 0xa31   :  { %v450_v29 = vmul.f32 %v448_v27, %v439_v28 }
 0xa33   :  { %452 = vrot.lane.b32.xlu2 %v450_v29, %s2305_s4 }
 0xa8d   :  { %v453_v32 = vpop.permute.xlu2 %452 }
 0xa8e   :  { %v455_v33 = vadd.f32 %v453_v32, %v445_v31 }
 0xa90   :  { %2115 = vtanh.f32 %v455_v33  ;;  %v512_v55 = vrot.slane %v455_v33, 4 }
 0xa96   :  { %v2116_v34 = vpop.eup %2115 }
 0xa97   :  { %458 = vrot.lane.b32.xlu0 %v2116_v34, %s2304_s13 }
 0xb09   :  { %v459_v36 = vpop.permute.xlu0 %458 }
 0xb0a   :  { %v2493_v38 = vmul.f32 %v459_v36, %v439_v28 }
 0xb0c   :  { %463 = vrot.lane.b32.xlu1 %v2493_v38, %s2305_s4 }
 0xb7e   :  { %v464_v39 = vpop.permute.xlu1 %463 }
 0xb7f   :  { %2026 = vmatmul.msk.f32.vlgmr.msra.gmra.mxu3 %vm128_vm5, %v464_v39 }
 0xc02   :  { %v484_v40 = vpop.f32.mrf.mxu3 }
 0xc03   :  { %v488_v41 = vrot.slane %v484_v40, 4  ;;  %v46_v40 = vld [vmem:[%s2892_s1 + $0x18] sm:$0xff] }
 0xc04   :  { %109 = vmatpush.msra.mxu1 %v46_v40 }
 0xc05   :  { %v490_v42 = vadd.f32 %v488_v41, %v90_v11  ;;  %v42_v11 = vld [vmem:[%s2891_s0 + $0x18] sm:$0xff]  ;;  %v44_v41 = vld [vmem:[%s2892_s1 + $0x8] sm:$0xff] }
 0xc06   :  { %2012 = vmatmul.msk.f32.gmra.mxu0 %vm53_vm0, %v42_v11  ;;  %110 = vmatpush.msra.mxu1 %v44_v41 }
 0xc07   :  { %2117 = vtanh.f32 %v490_v42  ;;  %v2027_v44 = vmul.f32 -1.442695, %v490_v42  ;;  %2013 = vmatmul.msk.f32.vlgmr.msra.gmra.mxu1 %vm53_vm0, %v2393_v5  ;;  %v674_v5 = vld [vmem:[%s2894_s3 + $0x10] sm:$0xff] }
 0xc09   :  { %2119 = vpow2.f32 %v2027_v44  ;;  %v675_v44 = vld [vmem:[%s2894_s3 + $0x18] sm:$0xff] }
 0xc0a   :  { %688 = vmatpush.msra.mxu3 %v675_v44  ;;  %755 = vmatpush.msrb.mxu1 %v675_v44 }
 0xc0b   :  { %821 = vmatpush.msra.mxu2 %v675_v44  ;;  %957 = vmatpush.msrb.mxu0 %v675_v44 }
 0xc0c   :  { %689 = vmatpush.msra.mxu3 %v674_v5  ;;  %756 = vmatpush.msrb.mxu1 %v674_v5 }
 0xc0d   :  { %v2118_v43 = vpop.eup %2117  ;;  %822 = vmatpush.msra.mxu2 %v674_v5  ;;  %958 = vmatpush.msrb.mxu0 %v674_v5 }
 0xc0e   :  { %516 = vrot.lane.b32.xlu2 %v2118_v43, %s2304_s13 }
 0xc0f   :  { %v2120_v45 = vpop.eup %2119  ;;  %2014 = vmatmul.msk.f32.gmra.mxu1 %vm53_vm0, %v2452_v2  ;;  %v673_v2 = vld [vmem:[%s2894_s3 + $0x8] sm:$0xff] }
 0xc10   :  { %v494_v46 = vadd.f32 1.0, %v2120_v45  ;;  %690 = vmatpush.msra.mxu3 %v673_v2  ;;  %757 = vmatpush.msrb.mxu1 %v673_v2 }
 0xc11   :  { %823 = vmatpush.msra.mxu2 %v673_v2  ;;  %959 = vmatpush.msrb.mxu0 %v673_v2 }
 0xc12   :  { %2121 = vrcp.f32 %v494_v46  ;;  %v506_v6 = vand.u32 2147483648, %v494_v46  ;;  %vm500_vm9 = vweird.f32 %v494_v46  ;;  %v504_v49 = vand.u32 2147483647, %v494_v46 }
 0xc14   :  { %v507_v51 = vor.u32 1.1754944e-38, %v506_v6  ;;  %vm505_vm11 = vcmp.eq.f32.partialorder %v504_v49, 8.507059e+37 }
 0xc17   :  { %2015 = vmatmul.msk.f32.gmra.mxu1 %vm53_vm0, %v2484_v63  ;;  %v672_v63 = vld [vmem:[%s2894_s3] sm:$0xff] }
 0xc18   :  { %v2122_v0 = vpop.eup %2121  ;;  %691 = vmatpush.msra.mxu3 %v672_v63  ;;  %758 = vmatpush.msrb.mxu1 %v672_v63 }
 0xc19   :  { %v496_v47 = vmul.f32 %v2122_v0, %v494_v46  ;;  %vm501_vm8 = vweird.f32 %v2122_v0  ;;  %824 = vmatpush.msra.mxu2 %v672_v63  ;;  %960 = vmatpush.msrb.mxu0 %v672_v63 }
 0xc1a   :  { %vm502_vm10 = vmor %vm500_vm9, %vm501_vm8  ;;  %1027 = vmatpush.msra.mxu1 %v675_v44 }
 0xc1b   :  { %v497_v1 = vsub.f32 1.0, %v496_v47 }
 0xc1c   :  { %1028 = vmatpush.msra.mxu1 %v674_v5 }
 0xc1d   :  { %v498_v48 = vmul.f32 %v2122_v0, %v497_v1 }
 0xc1e   :  { %1029 = vmatpush.msra.mxu1 %v673_v2 }
 0xc1f   :  { %v499_v4 = vadd.f32 %v2122_v0, %v498_v48  ;;  %2016 = vmatmul.msk.f32.gmra.mxu1 %vm53_vm0, %v42_v11 }
 0xc20   :  { %1030 = vmatpush.msra.mxu1 %v672_v63 }
 0xc21   :  { %v503_v50 = vsel %vm502_vm10, %v2122_v0, %v499_v4  ;;  %v2560_v4 = vperm.slane %v2424_v8, 1 }
 0xc22   :  { %v508_v53 = vsel %vm505_vm11, %v507_v51, %v503_v50 }
 0xc23   :  { %v514_v56 = vmul.f32 %v512_v55, %v508_v53 }
 0xc68   :  { %v517_v52 = vpop.permute.xlu2 %516 }
 0xc69   :  { %v519_v54 = vmul.f32 %v517_v52, %v508_v53 }
 0xc6b   :  { %521 = vrot.lane.b32.xlu0 %v519_v54, %s2305_s4 }
 0xc83   :  { %v92_v13 = vpop.f32.mrf.mxu0 }
 0xc84   :  { %v2511_v14 = vadd.f32 %v92_v13, %v2427_v9  ;;  %v2551_v46 = vpop.f32.mrf.mxu1 }
 0xc8c   :  { %v2553_v0 = vpop.f32.mrf.mxu1 }
 0xc94   :  { %v2555_v47 = vpop.f32.mrf.mxu1 }
 0xc9c   :  { %v121_v48 = vpop.f32.mrf.mxu1 }
 0xc9d   :  { %v122_v6 = vadd.f32 %v121_v48, %v2560_v4 }
 0xcdd   :  { %v522_v57 = vpop.permute.xlu0 %521 }
 0xcde   :  { %v524_v58 = vadd.f32 %v522_v57, %v514_v56 }
 0xce0   :  { %2123 = vtanh.f32 %v524_v58  ;;  %v579_v32 = vrot.slane %v524_v58, 4 }
 0xce6   :  { %v2124_v59 = vpop.eup %2123 }
 0xce7   :  { %527 = vrot.lane.b32.xlu1 %v2124_v59, %s2304_s13 }
 0xd59   :  { %v528_v61 = vpop.permute.xlu1 %527 }
 0xd5a   :  { %v2501_v3 = vmul.f32 %v528_v61, %v508_v53 }
 0xd5c   :  { %v532_v10 = vrot.slane %v2501_v3, 4 }
 0xd5e   :  { %533 = vrot.lane.b32.xlu2 %v532_v10, %s2305_s4 }
 0xdb8   :  { %v534_v12 = vpop.permute.xlu2 %533 }
 0xdb9   :  { %2028 = vmatmul.msk.f32.vlgmr.msrb.gmra.mxu2 %vm128_vm5, %v534_v12 }
 0xdba   :  { %1093 = vmatpush.msrb.mxu2 %v675_v44 }
 0xdbc   :  { %1094 = vmatpush.msrb.mxu2 %v674_v5 }
 0xdbe   :  { %1095 = vmatpush.msrb.mxu2 %v673_v2 }
 0xdc0   :  { %1096 = vmatpush.msrb.mxu2 %v672_v63 }
 0xe3c   :  { %v554_v15 = vpop.f32.mrf.mxu2 }
 0xe3d   :  { %v557_v16 = vadd.f32 %v554_v15, %v2511_v14 }
 0xe3f   :  { %2125 = vtanh.f32 %v557_v16  ;;  %v2029_v18 = vmul.f32 -1.442695, %v557_v16 }
 0xe41   :  { %2127 = vpow2.f32 %v2029_v18 }
 0xe45   :  { %v2126_v17 = vpop.eup %2125 }
 0xe46   :  { %583 = vrot.lane.b32.xlu0 %v2126_v17, %s2304_s13 }
 0xe47   :  { %v2128_v19 = vpop.eup %2127 }
 0xe48   :  { %v561_v20 = vadd.f32 1.0, %v2128_v19 }
 0xe4a   :  { %2129 = vrcp.f32 %v561_v20  ;;  %v573_v9 = vand.u32 2147483648, %v561_v20  ;;  %vm567_vm13 = vweird.f32 %v561_v20  ;;  %v571_v26 = vand.u32 2147483647, %v561_v20 }
 0xe4c   :  { %v574_v28 = vor.u32 1.1754944e-38, %v573_v9  ;;  %vm572_vm15 = vcmp.eq.f32.partialorder %v571_v26, 8.507059e+37 }
 0xe50   :  { %v2130_v21 = vpop.eup %2129 }
 0xe51   :  { %v563_v22 = vmul.f32 %v2130_v21, %v561_v20  ;;  %vm568_vm12 = vweird.f32 %v2130_v21 }
 0xe52   :  { %vm569_vm14 = vmor %vm567_vm13, %vm568_vm12 }
 0xe53   :  { %v564_v23 = vsub.f32 1.0, %v563_v22 }
 0xe55   :  { %v565_v24 = vmul.f32 %v2130_v21, %v564_v23 }
 0xe57   :  { %v566_v25 = vadd.f32 %v2130_v21, %v565_v24 }
 0xe59   :  { %v570_v27 = vsel %vm569_vm14, %v2130_v21, %v566_v25 }
 0xe5a   :  { %v575_v30 = vsel %vm572_vm15, %v574_v28, %v570_v27 }
 0xe5b   :  { %v581_v33 = vmul.f32 %v579_v32, %v575_v30 }
 0xeb8   :  { %v584_v29 = vpop.permute.xlu0 %583 }
 0xeb9   :  { %v586_v31 = vmul.f32 %v584_v29, %v575_v30 }
 0xebb   :  { %588 = vrot.lane.b32.xlu1 %v586_v31, %s2305_s4 }
 0xf2d   :  { %v589_v34 = vpop.permute.xlu1 %588 }
 0xf2e   :  { %v2516_v36 = vadd.f32 %v589_v34, %v581_v33 }
 0xf30   :  { %2131 = vtanh.f32 %v2516_v36 }
 0xf36   :  { %v2132_v39 = vpop.eup %2131 }
 0xf37   :  { %594 = vrot.lane.b32.xlu2 %v2132_v39, %s2304_s13 }
 0xf91   :  { %v595_v42 = vpop.permute.xlu2 %594 }
 0xf92   :  { %v2533_v43 = vmul.f32 %v595_v42, %v575_v30 }
 0xf94   :  { %599 = vrot.lane.b32.xlu0 %v2533_v43, %s2305_s4 }
0x1006   :  { %v600_v45 = vpop.permute.xlu0 %599 }
0x1007   :  { %2030 = vmatmul.msk.f32.vlgmr.msrb.gmra.mxu3 %vm128_vm5, %v600_v45 }
0x1008   :  { %891 = vmatpush.msrb.mxu3 %v675_v44 }
0x100a   :  { %892 = vmatpush.msrb.mxu3 %v674_v5 }
0x100c   :  { %893 = vmatpush.msrb.mxu3 %v673_v2 }
0x100e   :  { %894 = vmatpush.msrb.mxu3 %v672_v63 }
0x100f   :  { %692 = vmatmul.f32.vlgmr.msra.gmra.mxu3 %v2303_v7 }
0x1010   :  { %1163 = vmatpush.msra.mxu3 %v675_v44 }
0x1012   :  { %1164 = vmatpush.msra.mxu3 %v674_v5 }
0x1014   :  { %1165 = vmatpush.msra.mxu3 %v673_v2 }
0x1016   :  { %1166 = vmatpush.msra.mxu3 %v672_v63 }
0x108a   :  { %v2557_v1 = vpop.f32.mrf.mxu3 }
0x1092   :  { %v693_v49 = vpop.f32.mrf.mxu3 }
0x1093   :  { %v697_v50 = vrot.slane %v693_v49, 4 }
0x1095   :  { %v699_v51 = vadd.f32 %v697_v50, %v122_v6 }
0x1097   :  { %2133 = vtanh.f32 %v699_v51  ;;  %v2032_v53 = vmul.f32 -1.442695, %v699_v51 }
0x1099   :  { %2135 = vpow2.f32 %v2032_v53 }
0x109d   :  { %v2134_v52 = vpop.eup %2133 }
0x109e   :  { %722 = vrot.lane.b32.xlu1 %v2134_v52, %s2304_s13 }
0x109f   :  { %v2136_v54 = vpop.eup %2135 }
0x10a0   :  { %v703_v55 = vadd.f32 1.0, %v2136_v54  ;;  %v119_v54 = vadd.f32 %v2555_v47, %v2560_v4 }
0x10a2   :  { %2137 = vrcp.f32 %v703_v55  ;;  %v715_v61 = vand.u32 2147483648, %v703_v55  ;;  %vm709_vm1 = vweird.f32 %v703_v55  ;;  %v713_v10 = vand.u32 2147483647, %v703_v55 }
0x10a4   :  { %v716_v12 = vor.u32 1.1754944e-38, %v715_v61  ;;  %vm714_vm3 = vcmp.eq.f32.partialorder %v713_v10, 8.507059e+37 }
0x10a8   :  { %v2138_v56 = vpop.eup %2137 }
0x10a9   :  { %v705_v57 = vmul.f32 %v2138_v56, %v703_v55  ;;  %vm710_vm0 = vweird.f32 %v2138_v56 }
0x10aa   :  { %vm711_vm2 = vmor %vm709_vm1, %vm710_vm0 }
0x10ab   :  { %v706_v58 = vsub.f32 1.0, %v705_v57 }
0x10ad   :  { %v707_v59 = vmul.f32 %v2138_v56, %v706_v58 }
0x10af   :  { %v708_v8 = vadd.f32 %v2138_v56, %v707_v59 }
0x10b1   :  { %v712_v11 = vsel %vm711_vm2, %v2138_v56, %v708_v8 }
0x10b2   :  { %v717_v15 = vsel %vm714_vm3, %v716_v12, %v712_v11 }
0x10b3   :  { %v720_v17 = vmul.f32 0.0, %v717_v15 }
0x1110   :  { %v723_v13 = vpop.permute.xlu1 %722 }
0x1111   :  { %v725_v16 = vmul.f32 %v723_v13, %v717_v15 }
0x1113   :  { %727 = vrot.lane.b32.xlu2 %v725_v16, %s2305_s4 }
0x116d   :  { %v728_v18 = vpop.permute.xlu2 %727 }
0x116e   :  { %v730_v19 = vadd.f32 %v728_v18, %v720_v17 }
0x1170   :  { %2139 = vtanh.f32 %v730_v19  ;;  %v785_v63 = vrot.slane %v730_v19, 4 }
0x1176   :  { %v2140_v20 = vpop.eup %2139 }
0x1177   :  { %733 = vrot.lane.b32.xlu0 %v2140_v20, %s2304_s13 }
0x11e9   :  { %v734_v21 = vpop.permute.xlu0 %733 }
0x11ea   :  { %v2566_v22 = vmul.f32 %v734_v21, %v717_v15 }
0x11ec   :  { %v738_v23 = vrot.slane %v2566_v22, 4 }
0x11ee   :  { %739 = vrot.lane.b32.xlu1 %v738_v23, %s2305_s4 }
0x1260   :  { %v740_v24 = vpop.permute.xlu1 %739 }
0x1261   :  { %2033 = vmatmul.msk.f32.vlgmr.msrb.gmra.mxu1 %vm128_vm5, %v740_v24 }
0x12de   :  { %v760_v25 = vpop.f32.mrf.mxu1 }
0x12df   :  { %v763_v9 = vadd.f32 %v760_v25, %v122_v6 }
0x12e1   :  { %2141 = vtanh.f32 %v763_v9  ;;  %v2034_v27 = vmul.f32 -1.442695, %v763_v9 }
0x12e3   :  { %2143 = vpow2.f32 %v2034_v27 }
0x12e7   :  { %v2142_v26 = vpop.eup %2141 }
0x12e8   :  { %789 = vrot.lane.b32.xlu2 %v2142_v26, %s2304_s13 }
0x12e9   :  { %v2144_v28 = vpop.eup %2143 }
0x12ea   :  { %v767_v29 = vadd.f32 1.0, %v2144_v28 }
0x12ec   :  { %2145 = vrcp.f32 %v767_v29  ;;  %v779_v39 = vand.u32 2147483648, %v767_v29  ;;  %vm773_vm6 = vweird.f32 %v767_v29  ;;  %v777_v40 = vand.u32 2147483647, %v767_v29 }
0x12ee   :  { %v780_v42 = vor.u32 1.1754944e-38, %v779_v39  ;;  %vm778_vm8 = vcmp.eq.f32.partialorder %v777_v40, 8.507059e+37 }
0x12f2   :  { %v2146_v30 = vpop.eup %2145 }
0x12f3   :  { %v769_v31 = vmul.f32 %v2146_v30, %v767_v29  ;;  %vm774_vm4 = vweird.f32 %v2146_v30 }
0x12f4   :  { %vm775_vm7 = vmor %vm773_vm6, %vm774_vm4 }
0x12f5   :  { %v770_v32 = vsub.f32 1.0, %v769_v31 }
0x12f7   :  { %v771_v33 = vmul.f32 %v2146_v30, %v770_v32 }
0x12f9   :  { %v772_v34 = vadd.f32 %v2146_v30, %v771_v33 }
0x12fb   :  { %v776_v41 = vsel %vm775_vm7, %v2146_v30, %v772_v34 }
0x12fc   :  { %v781_v5 = vsel %vm778_vm8, %v780_v42, %v776_v41 }
0x12fd   :  { %v787_v45 = vmul.f32 %v785_v63, %v781_v5 }
0x1342   :  { %v790_v44 = vpop.permute.xlu2 %789 }
0x1343   :  { %v792_v2 = vmul.f32 %v790_v44, %v781_v5 }
0x1345   :  { %794 = vrot.lane.b32.xlu0 %v792_v2, %s2305_s4 }
0x13b7   :  { %v795_v48 = vpop.permute.xlu0 %794 }
0x13b8   :  { %v797_v6 = vadd.f32 %v795_v48, %v787_v45 }
0x13ba   :  { %2147 = vtanh.f32 %v797_v6  ;;  %v854_v21 = vrot.slane %v797_v6, 4 }
0x13c0   :  { %v2148_v49 = vpop.eup %2147 }
0x13c1   :  { %800 = vrot.lane.b32.xlu1 %v2148_v49, %s2304_s13 }
0x1433   :  { %v801_v50 = vpop.permute.xlu1 %800 }
0x1434   :  { %v2574_v51 = vmul.f32 %v801_v50, %v781_v5 }
0x1436   :  { %805 = vrot.lane.b32.xlu2 %v2574_v51, %s2305_s4 }
0x1490   :  { %v806_v52 = vpop.permute.xlu2 %805 }
0x1491   :  { %2035 = vmatmul.msk.f32.vlgmr.msra.gmra.mxu2 %vm128_vm5, %v806_v52 }
0x1514   :  { %v826_v53 = vpop.f32.mrf.mxu2 }
0x1515   :  { %v830_v55 = vrot.slane %v826_v53, 4 }
0x1517   :  { %v832_v56 = vadd.f32 %v830_v55, %v119_v54 }
0x1519   :  { %2149 = vtanh.f32 %v832_v56  ;;  %v2036_v58 = vmul.f32 -1.442695, %v832_v56 }
0x151b   :  { %2151 = vpow2.f32 %v2036_v58 }
0x151f   :  { %v2150_v57 = vpop.eup %2149 }
0x1520   :  { %858 = vrot.lane.b32.xlu0 %v2150_v57, %s2304_s13 }
0x1521   :  { %v2152_v59 = vpop.eup %2151 }
0x1522   :  { %v836_v8 = vadd.f32 1.0, %v2152_v59 }
0x1524   :  { %2153 = vrcp.f32 %v836_v8  ;;  %v848_v15 = vand.u32 2147483648, %v836_v8  ;;  %vm842_vm10 = vweird.f32 %v836_v8  ;;  %v846_v47 = vand.u32 2147483647, %v836_v8 }
0x1526   :  { %v849_v17 = vor.u32 1.1754944e-38, %v848_v15  ;;  %vm847_vm12 = vcmp.eq.f32.partialorder %v846_v47, 8.507059e+37 }
0x152a   :  { %v2154_v61 = vpop.eup %2153 }
0x152b   :  { %v838_v10 = vmul.f32 %v2154_v61, %v836_v8  ;;  %vm843_vm9 = vweird.f32 %v2154_v61 }
0x152c   :  { %vm844_vm11 = vmor %vm842_vm10, %vm843_vm9 }
0x152d   :  { %v839_v11 = vsub.f32 1.0, %v838_v10 }
0x152f   :  { %v840_v12 = vmul.f32 %v2154_v61, %v839_v11 }
0x1531   :  { %v841_v13 = vadd.f32 %v2154_v61, %v840_v12 }
0x1533   :  { %v845_v16 = vsel %vm844_vm11, %v2154_v61, %v841_v13  ;;  %v116_v61 = vadd.f32 %v2553_v0, %v2560_v4 }
0x1534   :  { %v850_v19 = vsel %vm847_vm12, %v849_v17, %v845_v16 }
0x1535   :  { %v856_v23 = vmul.f32 %v854_v21, %v850_v19 }
0x1592   :  { %v859_v18 = vpop.permute.xlu0 %858 }
0x1593   :  { %v861_v20 = vmul.f32 %v859_v18, %v850_v19 }
0x1595   :  { %863 = vrot.lane.b32.xlu1 %v861_v20, %s2305_s4 }
0x1607   :  { %v864_v24 = vpop.permute.xlu1 %863 }
0x1608   :  { %v866_v25 = vadd.f32 %v864_v24, %v856_v23 }
0x160a   :  { %2155 = vtanh.f32 %v866_v25  ;;  %v921_v52 = vrot.slane %v866_v25, 4 }
0x1610   :  { %v2156_v9 = vpop.eup %2155 }
0x1611   :  { %869 = vrot.lane.b32.xlu2 %v2156_v9, %s2304_s13 }
0x166b   :  { %v870_v26 = vpop.permute.xlu2 %869 }
0x166c   :  { %v2584_v27 = vmul.f32 %v870_v26, %v850_v19 }
0x166e   :  { %v874_v28 = vrot.slane %v2584_v27, 4 }
0x1670   :  { %875 = vrot.lane.b32.xlu0 %v874_v28, %s2305_s4 }
0x16e2   :  { %v876_v29 = vpop.permute.xlu0 %875 }
0x16e3   :  { %2037 = vmatmul.msk.f32.vlgmr.msrb.gmra.mxu3 %vm128_vm5, %v876_v29 }
0x1766   :  { %v896_v30 = vpop.f32.mrf.mxu3 }
0x1767   :  { %v899_v31 = vadd.f32 %v896_v30, %v119_v54 }
0x1769   :  { %2157 = vtanh.f32 %v899_v31  ;;  %v2038_v33 = vmul.f32 -1.442695, %v899_v31 }
0x176b   :  { %2159 = vpow2.f32 %v2038_v33 }
0x176f   :  { %v2158_v32 = vpop.eup %2157 }
0x1770   :  { %925 = vrot.lane.b32.xlu1 %v2158_v32, %s2304_s13 }
0x1771   :  { %v2160_v34 = vpop.eup %2159 }
0x1772   :  { %v903_v39 = vadd.f32 1.0, %v2160_v34 }
0x1774   :  { %2161 = vrcp.f32 %v903_v39  ;;  %v915_v2 = vand.u32 2147483648, %v903_v39  ;;  %vm909_vm14 = vweird.f32 %v903_v39  ;;  %v913_v63 = vand.u32 2147483647, %v903_v39 }
0x1776   :  { %v916_v48 = vor.u32 1.1754944e-38, %v915_v2  ;;  %vm914_vm0 = vcmp.eq.f32.partialorder %v913_v63, 8.507059e+37 }
0x177a   :  { %v2162_v40 = vpop.eup %2161 }
0x177b   :  { %v905_v41 = vmul.f32 %v2162_v40, %v903_v39  ;;  %vm910_vm13 = vweird.f32 %v2162_v40 }
0x177c   :  { %vm911_vm15 = vmor %vm909_vm14, %vm910_vm13  ;;  %vm667_vm14 = vcmask 1043456  }
0x177d   :  { %v906_v42 = vsub.f32 1.0, %v905_v41 }
0x177f   :  { %v907_v44 = vmul.f32 %v2162_v40, %v906_v42 }
0x1781   :  { %v908_v5 = vadd.f32 %v2162_v40, %v907_v44 }
0x1783   :  { %v912_v45 = vsel %vm911_vm15, %v2162_v40, %v908_v5 }
0x1784   :  { %v917_v49 = vsel %vm914_vm0, %v916_v48, %v912_v45 }
0x1785   :  { %v923_v53 = vmul.f32 %v921_v52, %v917_v49 }
0x17e2   :  { %v926_v6 = vpop.permute.xlu1 %925 }
0x17e3   :  { %v928_v50 = vmul.f32 %v926_v6, %v917_v49 }
0x17e5   :  { %930 = vrot.lane.b32.xlu2 %v928_v50, %s2305_s4 }
0x183f   :  { %v931_v54 = vpop.permute.xlu2 %930 }
0x1840   :  { %v933_v55 = vadd.f32 %v931_v54, %v923_v53 }
0x1842   :  { %2163 = vtanh.f32 %v933_v55  ;;  %v990_v28 = vrot.slane %v933_v55, 4 }
0x1848   :  { %v2164_v56 = vpop.eup %2163 }
0x1849   :  { %936 = vrot.lane.b32.xlu0 %v2164_v56, %s2304_s13 }
0x18bb   :  { %v937_v57 = vpop.permute.xlu0 %936 }
0x18bc   :  { %v2592_v58 = vmul.f32 %v937_v57, %v917_v49 }
0x18be   :  { %941 = vrot.lane.b32.xlu1 %v2592_v58, %s2305_s4 }
0x1930   :  { %v942_v59 = vpop.permute.xlu1 %941 }
0x1931   :  { %2039 = vmatmul.msk.f32.vlgmr.msrb.gmra.mxu0 %vm128_vm5, %v942_v59 }
0x19ae   :  { %v962_v8 = vpop.f32.mrf.mxu0 }
0x19af   :  { %v966_v10 = vrot.slane %v962_v8, 4 }
0x19b1   :  { %v968_v11 = vadd.f32 %v966_v10, %v116_v61 }
0x19b3   :  { %2165 = vtanh.f32 %v968_v11  ;;  %v2040_v13 = vmul.f32 -1.442695, %v968_v11 }
0x19b5   :  { %2167 = vpow2.f32 %v2040_v13 }
0x19b9   :  { %v2166_v12 = vpop.eup %2165 }
0x19ba   :  { %994 = vrot.lane.b32.xlu2 %v2166_v12, %s2304_s13 }
0x19bb   :  { %v2168_v15 = vpop.eup %2167 }
0x19bc   :  { %v972_v47 = vadd.f32 1.0, %v2168_v15 }
0x19be   :  { %2169 = vrcp.f32 %v972_v47  ;;  %v984_v21 = vand.u32 2147483648, %v972_v47  ;;  %vm978_vm2 = vweird.f32 %v972_v47  ;;  %v982_v0 = vand.u32 2147483647, %v972_v47 }
0x19c0   :  { %v985_v24 = vor.u32 1.1754944e-38, %v984_v21  ;;  %vm983_vm4 = vcmp.eq.f32.partialorder %v982_v0, 8.507059e+37 }
0x19c4   :  { %v2170_v16 = vpop.eup %2169 }
0x19c5   :  { %v974_v17 = vmul.f32 %v2170_v16, %v972_v47  ;;  %vm979_vm1 = vweird.f32 %v2170_v16 }
0x19c6   :  { %vm980_vm3 = vmor %vm978_vm2, %vm979_vm1 }
0x19c7   :  { %v975_v18 = vsub.f32 1.0, %v974_v17  ;;  %v113_v17 = vadd.f32 %v2551_v46, %v2560_v4 }
0x19c9   :  { %v976_v19 = vmul.f32 %v2170_v16, %v975_v18 }
0x19cb   :  { %v977_v20 = vadd.f32 %v2170_v16, %v976_v19 }
0x19cd   :  { %v981_v23 = vsel %vm980_vm3, %v2170_v16, %v977_v20  ;;  %vm1274_vm3 = vcmask 523264  }
0x19ce   :  { %v986_v9 = vsel %vm983_vm4, %v985_v24, %v981_v23 }
0x19cf   :  { %v992_v29 = vmul.f32 %v990_v28, %v986_v9 }
0x1a14   :  { %v995_v25 = vpop.permute.xlu2 %994 }
0x1a15   :  { %v997_v26 = vmul.f32 %v995_v25, %v986_v9 }
0x1a17   :  { %999 = vrot.lane.b32.xlu0 %v997_v26, %s2305_s4 }
0x1a89   :  { %v1000_v30 = vpop.permute.xlu0 %999 }
0x1a8a   :  { %v1002_v31 = vadd.f32 %v1000_v30, %v992_v29 }
0x1a8c   :  { %2171 = vtanh.f32 %v1002_v31  ;;  %v1057_v8 = vrot.slane %v1002_v31, 4 }
0x1a92   :  { %v2172_v32 = vpop.eup %2171 }
0x1a93   :  { %1005 = vrot.lane.b32.xlu1 %v2172_v32, %s2304_s13 }
0x1b05   :  { %v1006_v33 = vpop.permute.xlu1 %1005 }
0x1b06   :  { %v2602_v34 = vmul.f32 %v1006_v33, %v986_v9 }
0x1b08   :  { %v1010_v39 = vrot.slane %v2602_v34, 4 }
0x1b0a   :  { %1011 = vrot.lane.b32.xlu2 %v1010_v39, %s2305_s4 }
0x1b64   :  { %v1012_v40 = vpop.permute.xlu2 %1011 }
0x1b65   :  { %2041 = vmatmul.msk.f32.vlgmr.msra.gmra.mxu1 %vm128_vm5, %v1012_v40 }
0x1be2   :  { %v1032_v41 = vpop.f32.mrf.mxu1 }
0x1be3   :  { %v1035_v42 = vadd.f32 %v1032_v41, %v116_v61 }
0x1be5   :  { %2173 = vtanh.f32 %v1035_v42  ;;  %v2042_v5 = vmul.f32 -1.442695, %v1035_v42 }
0x1be7   :  { %2175 = vpow2.f32 %v2042_v5 }
0x1beb   :  { %v2174_v44 = vpop.eup %2173 }
0x1bec   :  { %1061 = vrot.lane.b32.xlu0 %v2174_v44, %s2304_s13 }
0x1bed   :  { %v2176_v2 = vpop.eup %2175 }
0x1bee   :  { %v1039_v63 = vadd.f32 1.0, %v2176_v2 }
0x1bf0   :  { %2177 = vrcp.f32 %v1039_v63  ;;  %v1051_v52 = vand.u32 2147483648, %v1039_v63  ;;  %vm1045_vm7 = vweird.f32 %v1039_v63  ;;  %v1049_v53 = vand.u32 2147483647, %v1039_v63 }
0x1bf2   :  { %v1052_v55 = vor.u32 1.1754944e-38, %v1051_v52  ;;  %vm1050_vm9 = vcmp.eq.f32.partialorder %v1049_v53, 8.507059e+37 }
0x1bf6   :  { %v2178_v45 = vpop.eup %2177 }
0x1bf7   :  { %v1041_v48 = vmul.f32 %v2178_v45, %v1039_v63  ;;  %vm1046_vm6 = vweird.f32 %v2178_v45 }
0x1bf8   :  { %vm1047_vm8 = vmor %vm1045_vm7, %vm1046_vm6 }
0x1bf9   :  { %v1042_v6 = vsub.f32 1.0, %v1041_v48 }
0x1bfb   :  { %v1043_v49 = vmul.f32 %v2178_v45, %v1042_v6 }
0x1bfd   :  { %v1044_v50 = vadd.f32 %v2178_v45, %v1043_v49 }
0x1bff   :  { %v1048_v54 = vsel %vm1047_vm8, %v2178_v45, %v1044_v50  ;;  %v668_v50 = vsel %vm667_vm14, %v2433_v35, %v2445_v62 }
0x1c00   :  { %v1053_v57 = vsel %vm1050_vm9, %v1052_v55, %v1048_v54 }
0x1c01   :  { %v1059_v61 = vmul.f32 %v1057_v8, %v1053_v57 }
0x1c5e   :  { %v1062_v56 = vpop.permute.xlu0 %1061 }
0x1c5f   :  { %v1064_v59 = vmul.f32 %v1062_v56, %v1053_v57 }
0x1c61   :  { %1066 = vrot.lane.b32.xlu1 %v1064_v59, %s2305_s4 }
0x1cd3   :  { %v1067_v10 = vpop.permute.xlu1 %1066 }
0x1cd4   :  { %v1069_v11 = vadd.f32 %v1067_v10, %v1059_v61 }
0x1cd6   :  { %2179 = vtanh.f32 %v1069_v11  ;;  %v1126_v39 = vrot.slane %v1069_v11, 4 }
0x1cdc   :  { %v2180_v12 = vpop.eup %2179 }
0x1cdd   :  { %1072 = vrot.lane.b32.xlu2 %v2180_v12, %s2304_s13 }
0x1d37   :  { %v1073_v13 = vpop.permute.xlu2 %1072 }
0x1d38   :  { %v2610_v15 = vmul.f32 %v1073_v13, %v1053_v57 }
0x1d3a   :  { %1077 = vrot.lane.b32.xlu0 %v2610_v15, %s2305_s4 }
0x1dac   :  { %v1078_v47 = vpop.permute.xlu0 %1077 }
0x1dad   :  { %2043 = vmatmul.msk.f32.vlgmr.msrb.gmra.mxu2 %vm128_vm5, %v1078_v47 }
0x1e30   :  { %v1098_v16 = vpop.f32.mrf.mxu2 }
0x1e31   :  { %v1102_v18 = vrot.slane %v1098_v16, 4 }
0x1e33   :  { %v1104_v19 = vadd.f32 %v1102_v18, %v113_v17 }
0x1e35   :  { %2181 = vtanh.f32 %v1104_v19  ;;  %v2044_v21 = vmul.f32 -1.442695, %v1104_v19 }
0x1e37   :  { %2183 = vpow2.f32 %v2044_v21  ;;  %v1267_v21 = vld [vmem:[%s2896_s5 + $0x78] sm:$0xff] }
0x1e38   :  { %1324 = vmatpush.msrb.mxu1 %v1267_v21 }
0x1e3b   :  { %v2182_v20 = vpop.eup %2181 }
0x1e3c   :  { %1130 = vrot.lane.b32.xlu1 %v2182_v20, %s2304_s13  ;;  %v1266_v20 = vld [vmem:[%s2896_s5 + $0x70] sm:$0xff] }
0x1e3d   :  { %v2184_v0 = vpop.eup %2183  ;;  %1295 = vmatpush.msra.mxu0 %v1266_v20 }
0x1e3e   :  { %v1108_v23 = vadd.f32 1.0, %v2184_v0  ;;  %v1264_v0 = vld [vmem:[%s2896_s5 + $0x60] sm:$0xff] }
0x1e3f   :  { %1296 = vmatpush.msra.mxu0 %v1264_v0 }
0x1e40   :  { %2185 = vrcp.f32 %v1108_v23  ;;  %v1120_v29 = vand.u32 2147483648, %v1108_v23  ;;  %vm1114_vm11 = vweird.f32 %v1108_v23  ;;  %v1118_v46 = vand.u32 2147483647, %v1108_v23 }
0x1e42   :  { %v1121_v30 = vor.u32 1.1754944e-38, %v1120_v29  ;;  %vm1119_vm13 = vcmp.eq.f32.partialorder %v1118_v46, 8.507059e+37  ;;  %v1260_v29 = vld [vmem:[%s2896_s5 + $0x40] sm:$0xff]  ;;  %v1261_v46 = vld [vmem:[%s2896_s5 + $0x48] sm:$0xff] }
0x1e46   :  { %v2186_v24 = vpop.eup %2185 }
0x1e47   :  { %v1110_v25 = vmul.f32 %v2186_v24, %v1108_v23  ;;  %vm1115_vm10 = vweird.f32 %v2186_v24  ;;  %v1265_v23 = vld [vmem:[%s2896_s5 + $0x68] sm:$0xff] }
0x1e48   :  { %vm1116_vm12 = vmor %vm1114_vm11, %vm1115_vm10  ;;  %1325 = vmatpush.msrb.mxu1 %v1265_v23 }
0x1e49   :  { %v1111_v9 = vsub.f32 1.0, %v1110_v25  ;;  %v1262_v25 = vld [vmem:[%s2896_s5 + $0x50] sm:$0xff] }
0x1e4a   :  { %1297 = vmatpush.msra.mxu0 %v1262_v25 }
0x1e4b   :  { %v1112_v26 = vmul.f32 %v2186_v24, %v1111_v9  ;;  %v1263_v9 = vld [vmem:[%s2896_s5 + $0x58] sm:$0xff] }
0x1e4c   :  { %1326 = vmatpush.msrb.mxu1 %v1263_v9  ;;  %1298 = vmatpush.msra.mxu0 %v1260_v29 }
0x1e4d   :  { %v1113_v28 = vadd.f32 %v2186_v24, %v1112_v26  ;;  %v2663_v26 = vld [vmem:[%s2897_s6 + $0x10] sm:$0xff] }
0x1e4e   :  { %1327 = vmatpush.msrb.mxu1 %v1261_v46 }
0x1e4f   :  { %v1117_v4 = vsel %vm1116_vm12, %v2186_v24, %v1113_v28  ;;  %v2651_v24 = vld [vmem:[%s2897_s6 + $0x18] sm:$0xff]  ;;  %v2669_v28 = vld [vmem:[%s2897_s6 + $0x8] sm:$0xff] }
0x1e50   :  { %v1122_v32 = vsel %vm1119_vm13, %v1121_v30, %v1117_v4  ;;  %1358 = vmatpush.msra.mxu2 %v2651_v24  ;;  %1421 = vmatpush.msrb.mxu3 %v2651_v24  ;;  %v2682_v4 = vld [vmem:[%s2897_s6] sm:$0xff]  ;;  %v1258_v30 = vld [vmem:[%s2896_s5 + $0x30] sm:$0xff] }
0x1e51   :  { %v1128_v40 = vmul.f32 %v1126_v39, %v1122_v32  ;;  %1299 = vmatpush.msra.mxu0 %v1258_v30  ;;  %v1254_v39 = vld [vmem:[%s2896_s5 + $0x10] sm:$0xff] }
0x1e52   :  { %1359 = vmatpush.msra.mxu2 %v2663_v26  ;;  %1422 = vmatpush.msrb.mxu3 %v2663_v26 }
0x1e54   :  { %1360 = vmatpush.msra.mxu2 %v2669_v28  ;;  %1423 = vmatpush.msrb.mxu3 %v2669_v28 }
0x1e56   :  { %1361 = vmatpush.msra.mxu2 %v2682_v4  ;;  %1424 = vmatpush.msrb.mxu3 %v2682_v4 }
0x1e57   :  { %1362 = vmatmul.f32.vlgmr.msra.gmra.mxu2 %v2303_v7 }
0x1e58   :  { %1491 = vmatpush.msrb.mxu2 %v2651_v24 }
0x1e5a   :  { %1492 = vmatpush.msrb.mxu2 %v2663_v26 }
0x1e5c   :  { %1493 = vmatpush.msrb.mxu2 %v2669_v28 }
0x1e5e   :  { %1494 = vmatpush.msrb.mxu2 %v2682_v4 }
0x1e60   :  { %1627 = vmatpush.msra.mxu2 %v2651_v24 }
0x1e62   :  { %1628 = vmatpush.msra.mxu2 %v2663_v26 }
0x1e64   :  { %1629 = vmatpush.msra.mxu2 %v2669_v28 }
0x1e66   :  { %1630 = vmatpush.msra.mxu2 %v2682_v4 }
0x1eae   :  { %v1131_v31 = vpop.permute.xlu1 %1130 }
0x1eaf   :  { %v1133_v33 = vmul.f32 %v1131_v31, %v1122_v32  ;;  %v1259_v31 = vld [vmem:[%s2896_s5 + $0x38] sm:$0xff] }
0x1eb0   :  { %1328 = vmatpush.msrb.mxu1 %v1259_v31 }
0x1eb1   :  { %1135 = vrot.lane.b32.xlu2 %v1133_v33, %s2305_s4  ;;  %v1257_v33 = vld [vmem:[%s2896_s5 + $0x28] sm:$0xff] }
0x1eb2   :  { %1329 = vmatpush.msrb.mxu1 %v1257_v33 }
0x1f0b   :  { %v1136_v41 = vpop.permute.xlu2 %1135 }
0x1f0c   :  { %v1138_v42 = vadd.f32 %v1136_v41, %v1128_v40  ;;  %v1255_v40 = vld [vmem:[%s2896_s5 + $0x18] sm:$0xff] }
0x1f0d   :  { %1330 = vmatpush.msrb.mxu1 %v1255_v40 }
0x1f0e   :  { %2187 = vtanh.f32 %v1138_v42  ;;  %v1193_v47 = vrot.slane %v1138_v42, 4 }
0x1f14   :  { %v2188_v44 = vpop.eup %2187 }
0x1f15   :  { %1141 = vrot.lane.b32.xlu0 %v2188_v44, %s2304_s13 }
0x1f87   :  { %v1142_v5 = vpop.permute.xlu0 %1141 }
0x1f88   :  { %v2620_v2 = vmul.f32 %v1142_v5, %v1122_v32  ;;  %v1256_v32 = vld [vmem:[%s2896_s5 + $0x20] sm:$0xff] }
0x1f89   :  { %1300 = vmatpush.msra.mxu0 %v1256_v32  ;;  %v1252_v5 = vld [vmem:[%s2896_s5] sm:$0xff] }
0x1f8a   :  { %v1146_v63 = vrot.slane %v2620_v2, 4 }
0x1f8b   :  { %1301 = vmatpush.msra.mxu0 %v1254_v39 }
0x1f8c   :  { %1147 = vrot.lane.b32.xlu1 %v1146_v63, %s2305_s4  ;;  %v1253_v63 = vld [vmem:[%s2896_s5 + $0x8] sm:$0xff]  ;;  %s1998_s5 = sshll.u32 %s2306_s26, 4  ;;  %s1999_s5 = int_to_ptr.vmem [resolvable:$true] %s1998_s5 }
0x1f8d   :  { %1302 = vmatpush.msra.mxu0 %v1252_v5  ;;  %1331 = vmatpush.msrb.mxu1 %v1253_v63 }
0x1ffe   :  { %v1148_v45 = vpop.permute.xlu1 %1147 }
0x1fff   :  { %2045 = vmatmul.msk.f32.vlgmr.msra.gmra.mxu3 %vm128_vm5, %v1148_v45 }
0x2000   :  { %1557 = vmatpush.msra.mxu3 %v2651_v24 }
0x2002   :  { %1558 = vmatpush.msra.mxu3 %v2663_v26 }
0x2004   :  { %1559 = vmatpush.msra.mxu3 %v2669_v28 }
0x2006   :  { %1560 = vmatpush.msra.mxu3 %v2682_v4 }
0x2082   :  { %v1168_v48 = vpop.f32.mrf.mxu3 }
0x2083   :  { %v1171_v6 = vadd.f32 %v1168_v48, %v113_v17 }
0x2085   :  { %2189 = vtanh.f32 %v1171_v6  ;;  %v2046_v52 = vmul.f32 -1.442695, %v1171_v6 }
0x2087   :  { %2191 = vpow2.f32 %v2046_v52 }
0x208b   :  { %v2190_v49 = vpop.eup %2189 }
0x208c   :  { %1197 = vrot.lane.b32.xlu2 %v2190_v49, %s2304_s13 }
0x208d   :  { %v2192_v53 = vpop.eup %2191 }
0x208e   :  { %v1175_v54 = vadd.f32 1.0, %v2192_v53 }
0x2090   :  { %2193 = vrcp.f32 %v1175_v54  ;;  %v1187_v61 = vand.u32 2147483648, %v1175_v54  ;;  %vm1181_vm0 = vweird.f32 %v1175_v54  ;;  %v1185_v10 = vand.u32 2147483647, %v1175_v54 }
0x2092   :  { %v1188_v12 = vor.u32 1.1754944e-38, %v1187_v61  ;;  %vm1186_vm2 = vcmp.eq.f32.partialorder %v1185_v10, 8.507059e+37 }
0x2094   :  { %1220 = vrot.lane.b32.xlu2 %v668_v50, %s2305_s4  ;;  %v1363_v50 = vpop.f32.mrf.mxu2 }
0x2096   :  { %v2194_v55 = vpop.eup %2193 }
0x2097   :  { %v1177_v56 = vmul.f32 %v2194_v55, %v1175_v54  ;;  %vm1182_vm15 = vweird.f32 %v2194_v55 }
0x2098   :  { %vm1183_vm1 = vmor %vm1181_vm0, %vm1182_vm15 }
0x2099   :  { %v1178_v57 = vsub.f32 1.0, %v1177_v56 }
0x209b   :  { %v1179_v59 = vmul.f32 %v2194_v55, %v1178_v57 }
0x209d   :  { %v1180_v8 = vadd.f32 %v2194_v55, %v1179_v59 }
0x209f   :  { %v1184_v11 = vsel %vm1183_vm1, %v2194_v55, %v1180_v8 }
0x20a0   :  { %v2630_v62 = vsel %vm1186_vm2, %v1188_v12, %v1184_v11 }
0x20a1   :  { %v1195_v16 = vmul.f32 %v1193_v47, %v2630_v62 }
0x20e6   :  { %v1198_v35 = vpop.permute.xlu2 %1197 }
0x20e7   :  { %v1200_v13 = vmul.f32 %v1198_v35, %v2630_v62 }
0x20e9   :  { %1202 = vrot.lane.b32.xlu0 %v1200_v13, %s2305_s4 }
0x20ee   :  { %v1221_v45 = vpop.permute.xlu2 %1220 }
0x215b   :  { %v1203_v17 = vpop.permute.xlu0 %1202 }
0x215c   :  { %v1205_v18 = vadd.f32 %v1203_v17, %v1195_v16 }
0x215e   :  { %2195 = vtanh.f32 %v1205_v18 }
0x2164   :  { %v2196_v19 = vpop.eup %2195 }
0x2165   :  { %1208 = vrot.lane.b32.xlu1 %v2196_v19, %s2304_s13 }
0x21d7   :  { %v1209_v41 = vpop.permute.xlu1 %1208 }
0x21d8   :  { %v1211_v42 = vmul.f32 %v1209_v41, %v2630_v62 }
0x21da   :  { %v1212_v44 = vsel %vm667_vm14, %v1211_v42, %v2620_v2  ;;  %v2735_v2 = vld [vmem:[%s2899_s8] sm:$0x3] }
0x21db   :  { %1236 = vrot.lane.b32.xlu0 %v1212_v44, %s2304_s13  ;;  %v2738_v49 = vperm.slane %v2735_v2, 0 }
0x224d   :  { %v1237_v48 = vpop.permute.xlu0 %1236 }
0x224e   :  { %v1248_v6 = vsel %vm128_vm5, %v1221_v45, %v1237_v48 }
0x224f   :  { %2047 = vmatmul.msk.f32.vlgmr.msra.gmra.mxu0 %vm1274_vm3, %v1248_v6  ;;  %2051 = vmatmul.msk.f32.vlgmr.msrb.gmra.mxu1 %vm1274_vm3, %v1248_v6 }
0x22cc   :  { %v1304_v52 = vpop.f32.mrf.mxu0  ;;  %v1333_v53 = vpop.f32.mrf.mxu1 }
0x22cd   :  { %v1305_v54 = vadd.f32 %v1304_v52, %v2738_v49 }
0x22cf   :  { %v1366_v55 = vadd.f32 %v1363_v50, %v1305_v54 }
0x22d1   :  { %2197 = vtanh.f32 %v1366_v55  ;;  %v2055_v57 = vmul.f32 -1.442695, %v1366_v55  ;;  %v669_v55 = vsel %vm667_vm14, %v2465_v37, %v2477_v60 }
0x22d3   :  { %2199 = vpow2.f32 %v2055_v57 }
0x22d7   :  { %v2198_v56 = vpop.eup %2197 }
0x22d8   :  { %1389 = vrot.lane.b32.xlu1 %v2198_v56, %s2304_s13 }
0x22d9   :  { %v2200_v59 = vpop.eup %2199 }
0x22da   :  { %v1370_v8 = vadd.f32 1.0, %v2200_v59 }
0x22dc   :  { %2201 = vrcp.f32 %v1370_v8  ;;  %v1382_v62 = vand.u32 2147483648, %v1370_v8  ;;  %vm1376_vm6 = vweird.f32 %v1370_v8  ;;  %v1380_v13 = vand.u32 2147483647, %v1370_v8 }
0x22de   :  { %v1383_v16 = vor.u32 1.1754944e-38, %v1382_v62  ;;  %vm1381_vm8 = vcmp.eq.f32.partialorder %v1380_v13, 8.507059e+37 }
0x22e2   :  { %v2202_v61 = vpop.eup %2201 }
0x22e3   :  { %v1372_v10 = vmul.f32 %v2202_v61, %v1370_v8  ;;  %vm1377_vm4 = vweird.f32 %v2202_v61 }
0x22e4   :  { %vm1378_vm7 = vmor %vm1376_vm6, %vm1377_vm4 }
0x22e5   :  { %v1373_v11 = vsub.f32 1.0, %v1372_v10  ;;  %v1213_v10 = vsel %vm667_vm14, %v2610_v15, %v2602_v34 }
0x22e7   :  { %v1374_v12 = vmul.f32 %v2202_v61, %v1373_v11 }
0x22e9   :  { %v1375_v35 = vadd.f32 %v2202_v61, %v1374_v12 }
0x22eb   :  { %v1379_v47 = vsel %vm1378_vm7, %v2202_v61, %v1375_v35 }
0x22ec   :  { %v1384_v18 = vsel %vm1381_vm8, %v1383_v16, %v1379_v47 }
0x22ed   :  { %v1387_v20 = vmul.f32 0.0, %v1384_v18 }
0x234a   :  { %v1390_v17 = vpop.permute.xlu1 %1389 }
0x234b   :  { %v1392_v19 = vmul.f32 %v1390_v17, %v1384_v18 }
0x234d   :  { %1394 = vrot.lane.b32.xlu2 %v1392_v19, %s2305_s4 }
0x23a7   :  { %v1395_v21 = vpop.permute.xlu2 %1394 }
0x23a8   :  { %v1397_v0 = vadd.f32 %v1395_v21, %v1387_v20 }
0x23aa   :  { %2203 = vtanh.f32 %v1397_v0  ;;  %v1454_v56 = vrot.slane %v1397_v0, 4 }
0x23b0   :  { %v2204_v23 = vpop.eup %2203 }
0x23b1   :  { %1400 = vrot.lane.b32.xlu0 %v2204_v23, %s2304_s13 }
0x2423   :  { %v1401_v25 = vpop.permute.xlu0 %1400 }
0x2424   :  { %v1403_v9 = vmul.f32 %v1401_v25, %v1384_v18 }
0x2426   :  { %1405 = vrot.lane.b32.xlu1 %v1403_v9, %s2305_s4 }
0x2498   :  { %v1406_v29 = vpop.permute.xlu1 %1405 }
0x2499   :  { %2056 = vmatmul.msk.f32.vlgmr.msrb.gmra.mxu3 %vm128_vm5, %v1406_v29 }
0x249a   :  { %1693 = vmatpush.msrb.mxu3 %v2651_v24 }
0x249c   :  { %1694 = vmatpush.msrb.mxu3 %v2663_v26 }
0x249e   :  { %1695 = vmatpush.msrb.mxu3 %v2669_v28 }
0x24a0   :  { %1696 = vmatpush.msrb.mxu3 %v2682_v4 }
0x251c   :  { %v1426_v46 = vpop.f32.mrf.mxu3 }
0x251d   :  { %v1430_v30 = vrot.slane %v1426_v46, 4 }
0x251f   :  { %v1432_v31 = vadd.f32 %v1430_v30, %v1305_v54 }
0x2521   :  { %2205 = vtanh.f32 %v1432_v31  ;;  %v2057_v33 = vmul.f32 -1.442695, %v1432_v31 }
0x2523   :  { %2207 = vpow2.f32 %v2057_v33 }
0x2527   :  { %v2206_v32 = vpop.eup %2205 }
0x2528   :  { %1458 = vrot.lane.b32.xlu2 %v2206_v32, %s2304_s13 }
0x2529   :  { %v2208_v39 = vpop.eup %2207 }
0x252a   :  { %v1436_v40 = vadd.f32 1.0, %v2208_v39 }
0x252c   :  { %2209 = vrcp.f32 %v1436_v40  ;;  %v1448_v45 = vand.u32 2147483648, %v1436_v40  ;;  %vm1442_vm10 = vweird.f32 %v1436_v40  ;;  %v1446_v48 = vand.u32 2147483647, %v1436_v40 }
0x252e   :  { %v1449_v50 = vor.u32 1.1754944e-38, %v1448_v45  ;;  %vm1447_vm12 = vcmp.eq.f32.partialorder %v1446_v48, 8.507059e+37 }
0x2532   :  { %v2210_v41 = vpop.eup %2209 }
0x2533   :  { %v1438_v42 = vmul.f32 %v2210_v41, %v1436_v40  ;;  %vm1443_vm9 = vweird.f32 %v2210_v41 }
0x2534   :  { %vm1444_vm11 = vmor %vm1442_vm10, %vm1443_vm9 }
0x2535   :  { %v1439_v44 = vsub.f32 1.0, %v1438_v42 }
0x2537   :  { %v1440_v5 = vmul.f32 %v2210_v41, %v1439_v44 }
0x2539   :  { %v1441_v63 = vadd.f32 %v2210_v41, %v1440_v5 }
0x253b   :  { %v1445_v6 = vsel %vm1444_vm11, %v2210_v41, %v1441_v63 }
0x253c   :  { %v1450_v53 = vsel %vm1447_vm12, %v1449_v50, %v1445_v6 }
0x253d   :  { %v1456_v57 = vmul.f32 %v1454_v56, %v1450_v53 }
0x2582   :  { %v1459_v52 = vpop.permute.xlu2 %1458 }
0x2583   :  { %v1461_v54 = vmul.f32 %v1459_v52, %v1450_v53 }
0x2585   :  { %1463 = vrot.lane.b32.xlu0 %v1461_v54, %s2305_s4 }
0x258d   :  { %1222 = vrot.lane.b32.xlu0 %v669_v55, %s2305_s4 }
0x25f7   :  { %v1464_v59 = vpop.permute.xlu0 %1463 }
0x25f8   :  { %v1466_v8 = vadd.f32 %v1464_v59, %v1456_v57 }
0x25fa   :  { %2211 = vtanh.f32 %v1466_v8  ;;  %v1521_v41 = vrot.slane %v1466_v8, 4 }
0x25ff   :  { %v1223_v37 = vpop.permute.xlu0 %1222 }
0x2600   :  { %v2212_v61 = vpop.eup %2211 }
0x2601   :  { %1469 = vrot.lane.b32.xlu1 %v2212_v61, %s2304_s13 }
0x2609   :  { %1238 = vrot.lane.b32.xlu1 %v1213_v10, %s2304_s13 }
0x2673   :  { %v1470_v11 = vpop.permute.xlu1 %1469 }
0x2674   :  { %v1472_v12 = vmul.f32 %v1470_v11, %v1450_v53 }
0x2676   :  { %v1474_v35 = vrot.slane %v1472_v12, 4 }
0x2678   :  { %1475 = vrot.lane.b32.xlu2 %v1474_v35, %s2305_s4 }
0x267b   :  { %v1239_v60 = vpop.permute.xlu1 %1238 }
0x267c   :  { %v1249_v62 = vsel %vm128_vm5, %v1223_v37, %v1239_v60  ;;  %v670_v60 = vsel %vm667_vm14, %v2493_v38, %v2501_v3 }
0x267d   :  { %2048 = vmatmul.msk.f32.gmra.mxu0 %vm1274_vm3, %v1249_v62  ;;  %2052 = vmatmul.msk.f32.gmra.mxu1 %vm1274_vm3, %v1249_v62 }
0x26d2   :  { %v1476_v13 = vpop.permute.xlu2 %1475 }
0x26d3   :  { %2058 = vmatmul.msk.f32.vlgmr.msrb.gmra.mxu2 %vm128_vm5, %v1476_v13 }
0x26d4   :  { %1763 = vmatpush.msrb.mxu2 %v2651_v24 }
0x26d6   :  { %1764 = vmatpush.msrb.mxu2 %v2663_v26 }
0x26d8   :  { %1765 = vmatpush.msrb.mxu2 %v2669_v28 }
0x26da   :  { %1766 = vmatpush.msrb.mxu2 %v2682_v4 }
0x26fa   :  { %v1335_v34 = vpop.f32.mrf.mxu1  ;;  %v1307_v15 = vpop.f32.mrf.mxu0 }
0x26fb   :  { %v1308_v47 = vadd.f32 %v1307_v15, %v2738_v49 }
0x2756   :  { %v1496_v16 = vpop.f32.mrf.mxu2 }
0x2757   :  { %v1499_v17 = vadd.f32 %v1496_v16, %v1308_v47  ;;  %v1214_v16 = vsel %vm667_vm14, %v2592_v58, %v2584_v27 }
0x2759   :  { %2213 = vtanh.f32 %v1499_v17  ;;  %v2059_v19 = vmul.f32 -1.442695, %v1499_v17 }
0x275b   :  { %2215 = vpow2.f32 %v2059_v19 }
0x275f   :  { %v2214_v18 = vpop.eup %2213 }
0x2760   :  { %1525 = vrot.lane.b32.xlu2 %v2214_v18, %s2304_s13 }
0x2761   :  { %v2216_v20 = vpop.eup %2215 }
0x2762   :  { %v1503_v21 = vadd.f32 1.0, %v2216_v20 }
0x2764   :  { %2217 = vrcp.f32 %v1503_v21  ;;  %v1515_v46 = vand.u32 2147483648, %v1503_v21  ;;  %vm1509_vm15 = vweird.f32 %v1503_v21  ;;  %v1513_v30 = vand.u32 2147483647, %v1503_v21 }
0x2766   :  { %v1516_v32 = vor.u32 1.1754944e-38, %v1515_v46  ;;  %vm1514_vm1 = vcmp.eq.f32.partialorder %v1513_v30, 8.507059e+37 }
0x276a   :  { %v2218_v0 = vpop.eup %2217 }
0x276b   :  { %v1505_v23 = vmul.f32 %v2218_v0, %v1503_v21  ;;  %vm1510_vm13 = vweird.f32 %v2218_v0 }
0x276c   :  { %vm1511_vm0 = vmor %vm1509_vm15, %vm1510_vm13 }
0x276d   :  { %v1506_v25 = vsub.f32 1.0, %v1505_v23 }
0x276f   :  { %v1507_v9 = vmul.f32 %v2218_v0, %v1506_v25 }
0x2771   :  { %v1508_v29 = vadd.f32 %v2218_v0, %v1507_v9 }
0x2773   :  { %v1512_v31 = vsel %vm1511_vm0, %v2218_v0, %v1508_v29 }
0x2774   :  { %v1517_v39 = vsel %vm1514_vm1, %v1516_v32, %v1512_v31 }
0x2775   :  { %v1523_v42 = vmul.f32 %v1521_v41, %v1517_v39 }
0x27ba   :  { %v1526_v33 = vpop.permute.xlu2 %1525 }
0x27bb   :  { %v1528_v40 = vmul.f32 %v1526_v33, %v1517_v39 }
0x27bd   :  { %1530 = vrot.lane.b32.xlu0 %v1528_v40, %s2305_s4 }
0x282f   :  { %v1531_v44 = vpop.permute.xlu0 %1530 }
0x2830   :  { %v1533_v5 = vadd.f32 %v1531_v44, %v1523_v42 }
0x2832   :  { %2219 = vtanh.f32 %v1533_v5  ;;  %v1590_v62 = vrot.slane %v1533_v5, 4 }
0x2838   :  { %v2220_v63 = vpop.eup %2219 }
0x2839   :  { %1536 = vrot.lane.b32.xlu1 %v2220_v63, %s2304_s13 }
0x28ab   :  { %v1537_v45 = vpop.permute.xlu1 %1536 }
0x28ac   :  { %v1539_v48 = vmul.f32 %v1537_v45, %v1517_v39 }
0x28ae   :  { %1541 = vrot.lane.b32.xlu2 %v1539_v48, %s2305_s4 }
0x2908   :  { %v1542_v6 = vpop.permute.xlu2 %1541 }
0x2909   :  { %2060 = vmatmul.msk.f32.vlgmr.msra.gmra.mxu3 %vm128_vm5, %v1542_v6 }
0x290a   :  { %1829 = vmatpush.msra.mxu3 %v2651_v24 }
0x290c   :  { %1830 = vmatpush.msra.mxu3 %v2663_v26 }
0x290e   :  { %1831 = vmatpush.msra.mxu3 %v2669_v28 }
0x2910   :  { %1832 = vmatpush.msra.mxu3 %v2682_v4 }
0x298c   :  { %v1562_v50 = vpop.f32.mrf.mxu3 }
0x298d   :  { %v1566_v52 = vrot.slane %v1562_v50, 4 }
0x298f   :  { %v1568_v53 = vadd.f32 %v1566_v52, %v1308_v47 }
0x2991   :  { %2221 = vtanh.f32 %v1568_v53  ;;  %v2061_v55 = vmul.f32 -1.442695, %v1568_v53 }
0x2993   :  { %2223 = vpow2.f32 %v2061_v55 }
0x2997   :  { %v2222_v54 = vpop.eup %2221 }
0x2998   :  { %1594 = vrot.lane.b32.xlu0 %v2222_v54, %s2304_s13  ;;  %v624_v54 = vrot.slane %v2557_v1, 4 }
0x2999   :  { %v2224_v56 = vpop.eup %2223 }
0x299a   :  { %v1572_v57 = vadd.f32 1.0, %v2224_v56  ;;  %v626_v55 = vadd.f32 %v624_v54, %v2511_v14 }
0x299c   :  { %2225 = vrcp.f32 %v1572_v57  ;;  %v1584_v28 = vand.u32 2147483648, %v1572_v57  ;;  %vm1578_vm4 = vweird.f32 %v1572_v57  ;;  %v1582_v4 = vand.u32 2147483647, %v1572_v57 }
0x299e   :  { %v1585_v11 = vor.u32 1.1754944e-38, %v1584_v28  ;;  %vm1583_vm7 = vcmp.eq.f32.partialorder %v1582_v4, 8.507059e+37 }
0x29a2   :  { %v2226_v59 = vpop.eup %2225 }
0x29a3   :  { %v1574_v24 = vmul.f32 %v2226_v59, %v1572_v57  ;;  %vm1579_vm2 = vweird.f32 %v2226_v59 }
0x29a4   :  { %vm1580_vm6 = vmor %vm1578_vm4, %vm1579_vm2 }
0x29a5   :  { %v1575_v8 = vsub.f32 1.0, %v1574_v24 }
0x29a7   :  { %v1576_v26 = vmul.f32 %v2226_v59, %v1575_v8 }
0x29a9   :  { %v1577_v61 = vadd.f32 %v2226_v59, %v1576_v26  ;;  %v2031_v26 = vmul.f32 -1.442695, %v626_v55 }
0x29ab   :  { %v1581_v10 = vsel %vm1580_vm6, %v2226_v59, %v1577_v61 }
0x29ac   :  { %v1586_v35 = vsel %vm1583_vm7, %v1585_v11, %v1581_v10 }
0x29ad   :  { %v1592_v13 = vmul.f32 %v1590_v62, %v1586_v35 }
0x2a0a   :  { %v1595_v12 = vpop.permute.xlu0 %1594 }
0x2a0b   :  { %v1597_v37 = vmul.f32 %v1595_v12, %v1586_v35 }
0x2a0d   :  { %1599 = vrot.lane.b32.xlu1 %v1597_v37, %s2305_s4 }
0x2a15   :  { %1224 = vrot.lane.b32.xlu1 %v670_v60, %s2305_s4 }
0x2a7f   :  { %v1600_v34 = vpop.permute.xlu1 %1599 }
0x2a80   :  { %v1602_v15 = vadd.f32 %v1600_v34, %v1592_v13 }
0x2a82   :  { %2227 = vtanh.f32 %v1602_v15  ;;  %v1657_v6 = vrot.slane %v1602_v15, 4 }
0x2a87   :  { %v1225_v38 = vpop.permute.xlu1 %1224 }
0x2a88   :  { %v2228_v47 = vpop.eup %2227 }
0x2a89   :  { %1605 = vrot.lane.b32.xlu2 %v2228_v47, %s2304_s13 }
0x2a91   :  { %1240 = vrot.lane.b32.xlu2 %v1214_v16, %s2304_s13 }
0x2ae3   :  { %v1606_v17 = vpop.permute.xlu2 %1605 }
0x2ae4   :  { %v1608_v18 = vmul.f32 %v1606_v17, %v1586_v35 }
0x2ae6   :  { %v1610_v19 = vrot.slane %v1608_v18, 4 }
0x2ae8   :  { %1611 = vrot.lane.b32.xlu0 %v1610_v19, %s2305_s4 }
0x2aeb   :  { %v1241_v3 = vpop.permute.xlu2 %1240 }
0x2aec   :  { %v1250_v20 = vsel %vm128_vm5, %v1225_v38, %v1241_v3 }
0x2aed   :  { %2049 = vmatmul.msk.f32.gmra.mxu0 %vm1274_vm3, %v1250_v20  ;;  %2053 = vmatmul.msk.f32.gmra.mxu1 %vm1274_vm3, %v1250_v20 }
0x2b5a   :  { %v1612_v21 = vpop.permute.xlu0 %1611 }
0x2b5b   :  { %2062 = vmatmul.msk.f32.vlgmr.msra.gmra.mxu2 %vm128_vm5, %v1612_v21 }
0x2b6a   :  { %v1337_v0 = vpop.f32.mrf.mxu1  ;;  %v1310_v27 = vpop.f32.mrf.mxu0 }
0x2b6b   :  { %v1311_v58 = vadd.f32 %v1310_v27, %v2738_v49 }
0x2bde   :  { %v1632_v23 = vpop.f32.mrf.mxu2 }
0x2bdf   :  { %v1635_v25 = vadd.f32 %v1632_v23, %v1311_v58 }
0x2be1   :  { %2229 = vtanh.f32 %v1635_v25  ;;  %v2063_v29 = vmul.f32 -1.442695, %v1635_v25 }
0x2be3   :  { %2231 = vpow2.f32 %v2063_v29 }
0x2be7   :  { %v2230_v9 = vpop.eup %2229 }
0x2be8   :  { %1661 = vrot.lane.b32.xlu0 %v2230_v9, %s2304_s13 }
0x2be9   :  { %v2232_v46 = vpop.eup %2231 }
0x2bea   :  { %v1639_v30 = vadd.f32 1.0, %v2232_v46 }
0x2bec   :  { %2233 = vrcp.f32 %v1639_v30  ;;  %v1651_v41 = vand.u32 2147483648, %v1639_v30  ;;  %vm1645_vm9 = vweird.f32 %v1639_v30  ;;  %v1649_v42 = vand.u32 2147483647, %v1639_v30 }
0x2bee   :  { %v1652_v5 = vor.u32 1.1754944e-38, %v1651_v41  ;;  %vm1650_vm11 = vcmp.eq.f32.partialorder %v1649_v42, 8.507059e+37  ;;  %v1215_v41 = vsel %vm667_vm14, %v2574_v51, %v2566_v22 }
0x2bf2   :  { %v2234_v31 = vpop.eup %2233 }
0x2bf3   :  { %v1641_v32 = vmul.f32 %v2234_v31, %v1639_v30  ;;  %vm1646_vm8 = vweird.f32 %v2234_v31 }
0x2bf4   :  { %vm1647_vm10 = vmor %vm1645_vm9, %vm1646_vm8 }
0x2bf5   :  { %v1642_v33 = vsub.f32 1.0, %v1641_v32 }
0x2bf7   :  { %v1643_v39 = vmul.f32 %v2234_v31, %v1642_v33 }
0x2bf9   :  { %v1644_v40 = vadd.f32 %v2234_v31, %v1643_v39 }
0x2bfb   :  { %v1648_v44 = vsel %vm1647_vm10, %v2234_v31, %v1644_v40  ;;  %v648_v31 = vrot.slane %v2516_v36, 4 }
0x2bfc   :  { %v1653_v45 = vsel %vm1650_vm11, %v1652_v5, %v1648_v44 }
0x2bfd   :  { %v1659_v50 = vmul.f32 %v1657_v6, %v1653_v45 }
0x2c5a   :  { %v1662_v63 = vpop.permute.xlu0 %1661 }
0x2c5b   :  { %v1664_v48 = vmul.f32 %v1662_v63, %v1653_v45 }
0x2c5d   :  { %1666 = vrot.lane.b32.xlu1 %v1664_v48, %s2305_s4 }
0x2ccf   :  { %v1667_v52 = vpop.permute.xlu1 %1666 }
0x2cd0   :  { %v2799_v53 = vadd.f32 %v1667_v52, %v1659_v50 }
0x2cd2   :  { %2235 = vtanh.f32 %v2799_v53  ;;  %v1726_v42 = vrot.slane %v2799_v53, 4 }
0x2cd3   :  { %2237 = vtanh.f32 %v626_v55  ;;  %v1884_v55 = vld [vmem:[%s2898_s7 + $0x18] sm:$0xff] }
0x2cd4   :  { %2239 = vpow2.f32 %v2031_v26  ;;  %1897 = vmatpush.msra.mxu2 %v1884_v55 }
0x2cd8   :  { %v2236_v56 = vpop.eup %2235 }
0x2cd9   :  { %1672 = vrot.lane.b32.xlu2 %v2236_v56, %s2304_s13  ;;  %v2238_v57 = vpop.eup %2237  ;;  %v1882_v56 = vld [vmem:[%s2898_s7 + $0x8] sm:$0xff] }
0x2cda   :  { %v2240_v1 = vpop.eup %2239 }
0x2cdb   :  { %v630_v61 = vadd.f32 1.0, %v2240_v1 }
0x2cdd   :  { %2241 = vrcp.f32 %v630_v61  ;;  %v642_v62 = vand.u32 2147483648, %v630_v61  ;;  %vm636_vm13 = vweird.f32 %v630_v61  ;;  %v640_v13 = vand.u32 2147483647, %v630_v61 }
0x2cdf   :  { %v643_v47 = vor.u32 1.1754944e-38, %v642_v62  ;;  %vm641_vm0 = vcmp.eq.f32.partialorder %v640_v13, 8.507059e+37 }
0x2ce1   :  { %652 = vrot.lane.b32.xlu2 %v2238_v57, %s2304_s13  ;;  %v1881_v57 = vld [vmem:[%s2898_s7] sm:$0xff] }
0x2ce3   :  { %v2242_v14 = vpop.eup %2241 }
0x2ce4   :  { %v632_v28 = vmul.f32 %v2242_v14, %v630_v61  ;;  %vm637_vm12 = vweird.f32 %v2242_v14 }
0x2ce5   :  { %vm638_vm15 = vmor %vm636_vm13, %vm637_vm12 }
0x2ce6   :  { %v633_v11 = vsub.f32 1.0, %v632_v28 }
0x2ce8   :  { %v634_v35 = vmul.f32 %v2242_v14, %v633_v11 }
0x2cea   :  { %v635_v37 = vadd.f32 %v2242_v14, %v634_v35 }
0x2cec   :  { %v639_v34 = vsel %vm638_vm15, %v2242_v14, %v635_v37 }
0x2ced   :  { %v644_v16 = vsel %vm641_vm0, %v643_v47, %v639_v34 }
0x2cee   :  { %v650_v32 = vmul.f32 %v648_v31, %v644_v16 }
0x2d33   :  { %v1673_v59 = vpop.permute.xlu2 %1672 }
0x2d34   :  { %v1675_v24 = vmul.f32 %v1673_v59, %v1653_v45 }
0x2d36   :  { %1677 = vrot.lane.b32.xlu0 %v1675_v24, %s2305_s4 }
0x2d3b   :  { %v653_v15 = vpop.permute.xlu2 %652 }
0x2d3c   :  { %v655_v17 = vmul.f32 %v653_v15, %v644_v16 }
0x2da8   :  { %v1678_v8 = vpop.permute.xlu0 %1677 }
0x2da9   :  { %2064 = vmatmul.msk.f32.vlgmr.msrb.gmra.mxu3 %vm128_vm5, %v1678_v8 }
0x2e2c   :  { %v1698_v4 = vpop.f32.mrf.mxu3 }
0x2e2d   :  { %v1702_v10 = vrot.slane %v1698_v4, 4 }
0x2e2f   :  { %v1704_v12 = vadd.f32 %v1702_v10, %v1311_v58 }
0x2e31   :  { %2243 = vtanh.f32 %v1704_v12  ;;  %v2065_v18 = vmul.f32 -1.442695, %v1704_v12 }
0x2e33   :  { %2245 = vpow2.f32 %v2065_v18 }
0x2e37   :  { %v2244_v60 = vpop.eup %2243 }
0x2e38   :  { %1730 = vrot.lane.b32.xlu1 %v2244_v60, %s2304_s13 }
0x2e39   :  { %v2246_v19 = vpop.eup %2245 }
0x2e3a   :  { %v1708_v38 = vadd.f32 1.0, %v2246_v19  ;;  %v1271_v19 = vperm.slane %v2735_v2, 1 }
0x2e3c   :  { %2247 = vrcp.f32 %v1708_v38  ;;  %v1720_v58 = vand.u32 2147483648, %v1708_v38  ;;  %vm1714_vm2 = vweird.f32 %v1708_v38  ;;  %v1718_v23 = vand.u32 2147483647, %v1708_v38 }
0x2e3e   :  { %v1721_v9 = vor.u32 1.1754944e-38, %v1720_v58  ;;  %vm1719_vm6 = vcmp.eq.f32.partialorder %v1718_v23, 8.507059e+37 }
0x2e40   :  { %657 = vrot.lane.b32.xlu1 %v655_v17, %s2305_s4 }
0x2e42   :  { %v2248_v3 = vpop.eup %2247 }
0x2e43   :  { %v1710_v20 = vmul.f32 %v2248_v3, %v1708_v38  ;;  %vm1715_vm1 = vweird.f32 %v2248_v3 }
0x2e44   :  { %vm1716_vm4 = vmor %vm1714_vm2, %vm1715_vm1 }
0x2e45   :  { %v1711_v21 = vsub.f32 1.0, %v1710_v20 }
0x2e47   :  { %v1712_v0 = vmul.f32 %v2248_v3, %v1711_v21 }
0x2e49   :  { %v1713_v27 = vadd.f32 %v2248_v3, %v1712_v0 }
0x2e4b   :  { %v1717_v25 = vsel %vm1716_vm4, %v2248_v3, %v1713_v27  ;;  %vm1991_vm4 = vcmask 27648  }
0x2e4c   :  { %v1722_v46 = vsel %vm1719_vm6, %v1721_v9, %v1717_v25 }
0x2e4d   :  { %v1728_v44 = vmul.f32 %v1726_v42, %v1722_v46 }
0x2eaa   :  { %v1731_v29 = vpop.permute.xlu1 %1730 }
0x2eab   :  { %v1733_v30 = vmul.f32 %v1731_v29, %v1722_v46 }
0x2ead   :  { %1735 = vrot.lane.b32.xlu0 %v1733_v30, %s2305_s4 }
0x2eb2   :  { %v658_v33 = vpop.permute.xlu1 %657 }
0x2eb3   :  { %v660_v39 = vadd.f32 %v658_v33, %v650_v32 }
0x2eb5   :  { %2249 = vtanh.f32 %v660_v39 }
0x2ebb   :  { %v2250_v40 = vpop.eup %2249 }
0x2ebc   :  { %663 = vrot.lane.b32.xlu0 %v2250_v40, %s2304_s13 }
0x2ec4   :  { %1242 = vrot.lane.b32.xlu0 %v1215_v41, %s2304_s13 }
0x2f1f   :  { %v1736_v5 = vpop.permute.xlu0 %1735 }
0x2f20   :  { %v1738_v63 = vadd.f32 %v1736_v5, %v1728_v44 }
0x2f22   :  { %2251 = vtanh.f32 %v1738_v63  ;;  %v1793_v47 = vrot.slane %v1738_v63, 4 }
0x2f28   :  { %v2252_v36 = vpop.eup %2251 }
0x2f29   :  { %1741 = vrot.lane.b32.xlu2 %v2252_v36, %s2304_s13 }
0x2f2e   :  { %v664_v45 = vpop.permute.xlu0 %663 }
0x2f2f   :  { %v666_v48 = vmul.f32 %v664_v45, %v644_v16 }
0x2f31   :  { %v671_v6 = vsel %vm667_vm14, %v2533_v43, %v666_v48  ;;  %v1883_v43 = vld [vmem:[%s2898_s7 + $0x10] sm:$0xff] }
0x2f32   :  { %1226 = vrot.lane.b32.xlu2 %v671_v6, %s2305_s4  ;;  %1898 = vmatpush.msra.mxu2 %v1883_v43 }
0x2f34   :  { %1899 = vmatpush.msra.mxu2 %v1882_v56 }
0x2f36   :  { %v1243_v52 = vpop.permute.xlu0 %1242  ;;  %1900 = vmatpush.msra.mxu2 %v1881_v57 }
0x2f83   :  { %v1742_v50 = vpop.permute.xlu2 %1741 }
0x2f84   :  { %v1744_v22 = vmul.f32 %v1742_v50, %v1722_v46 }
0x2f86   :  { %v1746_v51 = vrot.slane %v1744_v22, 4 }
0x2f88   :  { %1747 = vrot.lane.b32.xlu1 %v1746_v51, %s2305_s4 }
0x2f8c   :  { %v1227_v53 = vpop.permute.xlu2 %1226 }
0x2f8d   :  { %v1251_v54 = vsel %vm128_vm5, %v1227_v53, %v1243_v52 }
0x2f8e   :  { %2050 = vmatmul.msk.f32.gmra.mxu0 %vm1274_vm3, %v1251_v54  ;;  %2054 = vmatmul.msk.f32.gmra.mxu1 %vm1274_vm3, %v1251_v54 }
0x2ffa   :  { %v1748_v59 = vpop.permute.xlu1 %1747 }
0x2ffb   :  { %2066 = vmatmul.msk.f32.vlgmr.msrb.gmra.mxu2 %vm128_vm5, %v1748_v59 }
0x3003   :  { %1901 = vmatmul.f32.vlgmr.msra.gmra.mxu2 %v2303_v7 }
0x300b   :  { %v1313_v24 = vpop.f32.mrf.mxu0  ;;  %v1339_v3 = vpop.f32.mrf.mxu1 }
0x300c   :  { %v1314_v8 = vadd.f32 %v1313_v24, %v2738_v49  ;;  %v1340_v21 = vadd.f32 %v1339_v3, %v1271_v19 }
0x307e   :  { %v1768_v26 = vpop.f32.mrf.mxu2 }
0x307f   :  { %v1771_v1 = vadd.f32 %v1768_v26, %v1314_v8 }
0x3081   :  { %2253 = vtanh.f32 %v1771_v1  ;;  %v2067_v14 = vmul.f32 -1.442695, %v1771_v1 }
0x3083   :  { %2255 = vpow2.f32 %v2067_v14 }
0x3086   :  { %v1902_v17 = vpop.f32.mrf.mxu2 }
0x3087   :  { %v2254_v61 = vpop.eup %2253  ;;  %v1906_v20 = vrot.slane %v1902_v17, 4  ;;  %v1956_v17 = vld [vmem:[%s2900_s9 + $0x8] sm:$0xff] }
0x3088   :  { %1797 = vrot.lane.b32.xlu1 %v2254_v61, %s2304_s13 }
0x3089   :  { %v2256_v28 = vpop.eup %2255  ;;  %v1908_v0 = vadd.f32 %v1906_v20, %v1340_v21 }
0x308a   :  { %v1775_v4 = vadd.f32 1.0, %v2256_v28 }
0x308b   :  { %v2070_v9 = vmul.f32 -1.442695, %v1908_v0 }
0x308c   :  { %2257 = vrcp.f32 %v1775_v4  ;;  %v1787_v7 = vand.u32 2147483648, %v1775_v4  ;;  %vm1781_vm7 = vweird.f32 %v1775_v4  ;;  %v1785_v49 = vand.u32 2147483647, %v1775_v4 }
0x308e   :  { %v1788_v62 = vor.u32 1.1754944e-38, %v1787_v7  ;;  %vm1786_vm9 = vcmp.eq.f32.partialorder %v1785_v49, 8.507059e+37 }
0x3092   :  { %v2258_v10 = vpop.eup %2257 }
0x3093   :  { %v1777_v11 = vmul.f32 %v2258_v10, %v1775_v4  ;;  %vm1782_vm14 = vweird.f32 %v2258_v10 }
0x3094   :  { %vm1783_vm8 = vmor %vm1781_vm7, %vm1782_vm14 }
0x3095   :  { %v1778_v12 = vsub.f32 1.0, %v1777_v11 }
0x3097   :  { %v1779_v35 = vmul.f32 %v2258_v10, %v1778_v12 }
0x3099   :  { %v1780_v37 = vadd.f32 %v2258_v10, %v1779_v35 }
0x309b   :  { %v1784_v60 = vsel %vm1783_vm8, %v2258_v10, %v1780_v37 }
0x309c   :  { %v1789_v34 = vsel %vm1786_vm9, %v1788_v62, %v1784_v60  ;;  %v1962_v62 = vld [vmem:[%s2900_s9 + $0x38] sm:$0xff] }
0x309d   :  { %v1795_v16 = vmul.f32 %v1793_v47, %v1789_v34  ;;  %1979 = vmatpush.msrb.mxu0 %v1962_v62  ;;  %v1958_v47 = vld [vmem:[%s2900_s9 + $0x18] sm:$0xff] }
0x30fa   :  { %v1798_v13 = vpop.permute.xlu1 %1797 }
0x30fb   :  { %v1800_v15 = vmul.f32 %v1798_v13, %v1789_v34  ;;  %v1961_v13 = vld [vmem:[%s2900_s9 + $0x30] sm:$0xff] }
0x30fc   :  { %1980 = vmatpush.msrb.mxu0 %v1961_v13 }
0x30fd   :  { %1802 = vrot.lane.b32.xlu2 %v1800_v15, %s2305_s4  ;;  %v1959_v15 = vld [vmem:[%s2900_s9 + $0x20] sm:$0xff] }
0x3157   :  { %v1803_v18 = vpop.permute.xlu2 %1802 }
0x3158   :  { %v2844_v38 = vadd.f32 %v1803_v18, %v1795_v16  ;;  %v1957_v16 = vld [vmem:[%s2900_s9 + $0x10] sm:$0xff]  ;;  %v1955_v18 = vld [vmem:[%s2900_s9] sm:$0xff] }
0x315a   :  { %2259 = vtanh.f32 %v2844_v38  ;;  %v1862_v11 = vrot.slane %v2844_v38, 4 }
0x315b   :  { %2261 = vtanh.f32 %v1908_v0 }
0x315c   :  { %2263 = vpow2.f32 %v2070_v9 }
0x3160   :  { %v2260_v27 = vpop.eup %2259 }
0x3161   :  { %1808 = vrot.lane.b32.xlu0 %v2260_v27, %s2304_s13  ;;  %v2262_v58 = vpop.eup %2261  ;;  %v2076_v27 = vld [vmem:[%s2901_s10] ss:$0 sm:$0xff] }
0x3162   :  { %v2264_v29 = vpop.eup %2263 }
0x3163   :  { %v1912_v46 = vadd.f32 1.0, %v2264_v29 }
0x3165   :  { %2265 = vrcp.f32 %v1912_v46  ;;  %v1924_v5 = vand.u32 2147483648, %v1912_v46  ;;  %vm1918_vm11 = vweird.f32 %v1912_v46  ;;  %v1922_v63 = vand.u32 2147483647, %v1912_v46 }
0x3167   :  { %v1925_v45 = vor.u32 1.1754944e-38, %v1924_v5  ;;  %vm1923_vm13 = vcmp.eq.f32.partialorder %v1922_v63, 8.507059e+37 }
0x3169   :  { %1931 = vrot.lane.b32.xlu0 %v2262_v58, %s2304_s13 }
0x316b   :  { %v2266_v30 = vpop.eup %2265 }
0x316c   :  { %v1914_v31 = vmul.f32 %v2266_v30, %v1912_v46  ;;  %vm1919_vm10 = vweird.f32 %v2266_v30 }
0x316d   :  { %vm1920_vm12 = vmor %vm1918_vm11, %vm1919_vm10 }
0x316e   :  { %v1915_v39 = vsub.f32 1.0, %v1914_v31 }
0x3170   :  { %v1916_v41 = vmul.f32 %v2266_v30, %v1915_v39 }
0x3172   :  { %v1917_v42 = vadd.f32 %v2266_v30, %v1916_v41 }
0x3174   :  { %v1921_v36 = vsel %vm1920_vm12, %v2266_v30, %v1917_v42 }
0x3175   :  { %v1926_v6 = vsel %vm1923_vm13, %v1925_v45, %v1921_v36 }
0x3176   :  { %v1929_v14 = vmul.f32 0.0, %v1926_v6 }
0x31d3   :  { %v1809_v23 = vpop.permute.xlu0 %1808 }
0x31d4   :  { %v1811_v25 = vmul.f32 %v1809_v23, %v1789_v34  ;;  %v1960_v34 = vld [vmem:[%s2900_s9 + $0x28] sm:$0xff] }
0x31d5   :  { %1981 = vmatpush.msrb.mxu0 %v1960_v34 }
0x31d6   :  { %1813 = vrot.lane.b32.xlu1 %v1811_v25, %s2305_s4 }
0x31d7   :  { %1982 = vmatpush.msrb.mxu0 %v1959_v15 }
0x31d9   :  { %1983 = vmatpush.msrb.mxu0 %v1958_v47 }
0x31db   :  { %v1932_v48 = vpop.permute.xlu0 %1931  ;;  %1984 = vmatpush.msrb.mxu0 %v1957_v16 }
0x31dc   :  { %v1934_v50 = vmul.f32 %v1932_v48, %v1926_v6 }
0x31dd   :  { %1985 = vmatpush.msrb.mxu0 %v1956_v17 }
0x31df   :  { %1986 = vmatpush.msrb.mxu0 %v1955_v18 }
0x3248   :  { %v1814_v2 = vpop.permute.xlu1 %1813 }
0x3249   :  { %2068 = vmatmul.msk.f32.vlgmr.msra.gmra.mxu3 %vm128_vm5, %v1814_v2 }
0x32cc   :  { %v1834_v32 = vpop.f32.mrf.mxu3 }
0x32cd   :  { %v1838_v33 = vrot.slane %v1834_v32, 4 }
0x32cf   :  { %v1840_v40 = vadd.f32 %v1838_v33, %v1314_v8 }
0x32d1   :  { %2267 = vtanh.f32 %v1840_v40  ;;  %v2069_v22 = vmul.f32 -1.442695, %v1840_v40 }
0x32d3   :  { %2269 = vpow2.f32 %v2069_v22 }
0x32d7   :  { %v2268_v44 = vpop.eup %2267 }
0x32d8   :  { %1866 = vrot.lane.b32.xlu2 %v2268_v44, %s2304_s13 }
0x32d9   :  { %v2270_v51 = vpop.eup %2269 }
0x32da   :  { %v1844_v52 = vadd.f32 1.0, %v2270_v51 }
0x32dc   :  { %2271 = vrcp.f32 %v1844_v52  ;;  %v1856_v57 = vand.u32 2147483648, %v1844_v52  ;;  %vm1850_vm0 = vweird.f32 %v1844_v52  ;;  %v1854_v59 = vand.u32 2147483647, %v1844_v52 }
0x32de   :  { %v1857_v8 = vor.u32 1.1754944e-38, %v1856_v57  ;;  %vm1855_vm2 = vcmp.eq.f32.partialorder %v1854_v59, 8.507059e+37 }
0x32e0   :  { %1936 = vrot.lane.b32.xlu2 %v1934_v50, %s2305_s4 }
0x32e2   :  { %v2272_v53 = vpop.eup %2271 }
0x32e3   :  { %v1846_v54 = vmul.f32 %v2272_v53, %v1844_v52  ;;  %vm1851_vm15 = vweird.f32 %v2272_v53 }
0x32e4   :  { %vm1852_vm1 = vmor %vm1850_vm0, %vm1851_vm15 }
0x32e5   :  { %v1847_v55 = vsub.f32 1.0, %v1846_v54 }
0x32e7   :  { %v1848_v43 = vmul.f32 %v2272_v53, %v1847_v55 }
0x32e9   :  { %v1849_v56 = vadd.f32 %v2272_v53, %v1848_v43 }
0x32eb   :  { %v1853_v24 = vsel %vm1852_vm1, %v2272_v53, %v1849_v56 }
0x32ec   :  { %v1858_v1 = vsel %vm1855_vm2, %v1857_v8, %v1853_v24 }
0x32ed   :  { %v1864_v12 = vmul.f32 %v1862_v11, %v1858_v1 }
0x3332   :  { %v1867_v26 = vpop.permute.xlu2 %1866 }
0x3333   :  { %v1869_v61 = vmul.f32 %v1867_v26, %v1858_v1 }
0x3335   :  { %1871 = vrot.lane.b32.xlu1 %v1869_v61, %s2305_s4 }
0x333a   :  { %v1937_v28 = vpop.permute.xlu2 %1936 }
0x333b   :  { %v1939_v4 = vadd.f32 %v1937_v28, %v1929_v14 }
0x333d   :  { %2273 = vtanh.f32 %v1939_v4 }
0x3343   :  { %v2274_v10 = vpop.eup %2273 }
0x3344   :  { %1942 = vrot.lane.b32.xlu1 %v2274_v10, %s2304_s13 }
0x33a7   :  { %v1872_v35 = vpop.permute.xlu1 %1871 }
0x33a8   :  { %v1874_v37 = vadd.f32 %v1872_v35, %v1864_v12 }
0x33aa   :  { %2275 = vtanh.f32 %v1874_v37 }
0x33b0   :  { %v2276_v7 = vpop.eup %2275 }
0x33b1   :  { %1877 = vrot.lane.b32.xlu0 %v2276_v7, %s2304_s13 }
0x33b6   :  { %v1943_v49 = vpop.permute.xlu1 %1942 }
0x33b7   :  { %v1945_v60 = vmul.f32 %v1943_v49, %v1926_v6 }
0x33b9   :  { %1951 = vrot.lane.b32.xlu0 %v1945_v60, %s2304_s13 }
0x3423   :  { %v1878_v19 = vpop.permute.xlu0 %1877 }
0x3424   :  { %v1880_v38 = vmul.f32 %v1878_v19, %v1858_v1 }
0x3426   :  { %1947 = vrot.lane.b32.xlu2 %v1880_v38, %s2305_s4 }
0x342b   :  { %v1952_v3 = vpop.permute.xlu0 %1951 }
0x3480   :  { %v1948_v20 = vpop.permute.xlu2 %1947 }
0x3481   :  { %v1954_v21 = vsel %vm128_vm5, %v1948_v20, %v1952_v3 }
0x3482   :  { %v1968_v0 = vrot.slane %v1954_v21, 4 }
0x3484   :  { %2071 = vmatmul.msk.f32.vlgmr.msrb.gmra.mxu0 %vm1274_vm3, %v1968_v0 }
0x3501   :  { %v1988_v58 = vpop.f32.mrf.mxu0 }
0x3502   :  { %v1989_v23 = vadd.f32 %v2076_v27, %v1988_v58 }
0x3504   :  { %1992 = vst.msk [vmem:[#allocation2] sm:$0xf] %vm1991_vm4, %v1989_v23 }
0x3505   :  { %2003 = dma.vmem_to_hbm [thread:$0]  %s1999_s5, 64, %s2001_s27, [#allocation3]  }
0x3506   :  { %2301 = dma.done.wait [#allocation3], 64  }
0x3507   :  { %2302 = vsyncadd [#allocation3], 4294967232 }
0x3508   :  { %2008 = vsyncpa [#allocation3], 1 }

</bundles_post_ra>
